<compile_context>
chip_gen: v6e
topology: v6e:2x2x1
jax: 0.10.0
libtpu: 0.0.40
codegen_flags: <defaults>
</compile_context>

<pallas_src>
import jax
import jax.numpy as jnp
from jax.experimental import pallas as pl
from jax.experimental.pallas import tpu as pltpu

IN_DIM = 726
IN_PAD = 768          # 6 * 128 — lane-aligned contraction dim for the first matmul
H1 = 1024
H2 = 256
H3 = 64
OUT_NODES = 7
OUT_PAD = 128         # lane-dense head for the matmul + softmax compute
OUT_STORE = 8         # narrow lane count actually written back to HBM
NEG_BIG = -1e30       # padded-logit bias -> exp() underflows to 0, softmax unchanged


def _round_up(n, m):
    return ((n + m - 1) // m) * m


def _choose_tb(B, tb_max):
    """Batch tile: aim for >=2 grid steps (v7x megacore), 16-row aligned, <= tb_max."""
    tb = _round_up(pl.cdiv(B, 2), 16)
    return max(16, min(tb, tb_max))


def mlp_kernel(x_ref,
               w1_ref, b1_ref,
               w2_ref, b2_ref,
               w3_ref, b3_ref,
               w4_ref, b4_ref,
               out_ref, out2_ref):
    x = x_ref[...]                                                      # (TB, 768) bf16

    # input_layer + ReLU
    h1 = jnp.dot(x, w1_ref[...], preferred_element_type=jnp.float32) + b1_ref[...]
    h1 = jnp.maximum(h1, 0.0)                                           # (TB, 1024) f32

    # dense_layer1 + dropout(eval: identity) + ReLU  -> returned as out2 (bf16)
    h2 = jnp.dot(h1.astype(jnp.bfloat16), w2_ref[...],
                 preferred_element_type=jnp.float32) + b2_ref[...]
    h2 = jnp.maximum(h2, 0.0)                                           # (TB, 256) f32
    out2_ref[...] = h2.astype(jnp.bfloat16)

    # dense_layer2 + dropout(eval: identity) + ReLU
    h3 = jnp.dot(h2.astype(jnp.bfloat16), w3_ref[...],
                 preferred_element_type=jnp.float32) + b3_ref[...]
    h3 = jnp.maximum(h3, 0.0)                                           # (TB, 64) f32

    # output_layer (padded to 128 lanes) + softmax over dim=1
    logits = jnp.dot(h3.astype(jnp.bfloat16), w4_ref[...],
                     preferred_element_type=jnp.float32) + b4_ref[...]  # (TB, 128) f32
    m = jnp.max(logits, axis=1, keepdims=True)
    e = jnp.exp(logits - m)                                             # padded lanes -> 0
    probs = e / jnp.sum(e, axis=1, keepdims=True)
    out_ref[...] = probs[:, :OUT_STORE]                                 # narrow writeback


def prepare_params(params):
    """Pad + cast the raw (in,out)-layout f32 params for the kernel (done once)."""
    w1 = jnp.pad(params["w1"], ((0, IN_PAD - IN_DIM), (0, 0))).astype(jnp.bfloat16)
    w2 = params["w2"].astype(jnp.bfloat16)
    w3 = params["w3"].astype(jnp.bfloat16)
    w4 = jnp.pad(params["w4"], ((0, 0), (0, OUT_PAD - OUT_NODES))).astype(jnp.bfloat16)
    b4 = jnp.pad(params["b4"], ((0, 0), (0, OUT_PAD - OUT_NODES)),
                 constant_values=NEG_BIG)
    return {"w1": w1, "b1": params["b1"],
            "w2": w2, "b2": params["b2"],
            "w3": w3, "b3": params["b3"],
            "w4": w4, "b4": b4}


def k_model_forward(x, prepped, *, tb_max=1024):
    """x: (B, 726) float32.  prepped: output of prepare_params.
    Returns (softmax probs (B, 7) f32, post-relu hidden (B, 256) bf16)."""
    B = x.shape[0]
    TB = _choose_tb(B, tb_max)
    Bp = _round_up(B, TB)
    # Single fused pad+cast pass over x; kernel streams bf16 (half the HBM bytes).
    xp = jnp.pad(x, ((0, Bp - B), (0, IN_PAD - IN_DIM))).astype(jnp.bfloat16)

    const = lambda i: (0, 0)                # weights/biases stay resident in VMEM
    tiled = lambda i: (i, 0)                # batch-tiled arrays

    out_pad, out2_pad = pl.pallas_call(
        mlp_kernel,
        grid=(Bp // TB,),
        in_specs=[
            pl.BlockSpec((TB, IN_PAD), tiled),     # x (bf16)
            pl.BlockSpec((IN_PAD, H1), const),     # w1
            pl.BlockSpec((1, H1), const),          # b1
            pl.BlockSpec((H1, H2), const),         # w2
            pl.BlockSpec((1, H2), const),          # b2
            pl.BlockSpec((H2, H3), const),         # w3
            pl.BlockSpec((1, H3), const),          # b3
            pl.BlockSpec((H3, OUT_PAD), const),    # w4 (lane-padded)
            pl.BlockSpec((1, OUT_PAD), const),     # b4 (lane-padded, -1e30 fill)
        ],
        out_specs=(
            pl.BlockSpec((TB, OUT_STORE), tiled),  # probs, only 8 lanes stored
            pl.BlockSpec((TB, H2), tiled),         # hidden (bf16)
        ),
        out_shape=(
            jax.ShapeDtypeStruct((Bp, OUT_STORE), jnp.float32),
            jax.ShapeDtypeStruct((Bp, H2), jnp.bfloat16),
        ),
        compiler_params=pltpu.CompilerParams(
            dimension_semantics=("parallel",),
            vmem_limit_bytes=40 * 1024 * 1024,
        ),
    )(xp,
      prepped["w1"], prepped["b1"],
      prepped["w2"], prepped["b2"],
      prepped["w3"], prepped["b3"],
      prepped["w4"], prepped["b4"])

    return out_pad[:B, :OUT_NODES], out2_pad[:B]


def init_params(key):
    """Deterministic parameter init (shapes match K_model.__init__, stored as (in,out))."""
    ks = jax.random.split(key, 8)

    def linear(kw, kb, fan_in, fan_out):
        bound = 1.0 / jnp.sqrt(fan_in)
        w = jax.random.uniform(kw, (fan_in, fan_out), jnp.float32, -bound, bound)
        b = jax.random.uniform(kb, (1, fan_out), jnp.float32, -bound, bound)
        return w, b

    w1, b1 = linear(ks[0], ks[1], IN_DIM, H1)
    w2, b2 = linear(ks[2], ks[3], H1, H2)
    w3, b3 = linear(ks[4], ks[5], H2, H3)
    w4, b4 = linear(ks[6], ks[7], H3, OUT_NODES)
    return {"w1": w1, "b1": b1, "w2": w2, "b2": b2,
            "w3": w3, "b3": b3, "w4": w4, "b4": b4}


def reference_forward(x, p):
    """Pure-JAX f32 reference matching the PyTorch module in eval mode."""
    h1 = jnp.maximum(x @ p["w1"] + p["b1"], 0.0)
    h2 = jnp.maximum(h1 @ p["w2"] + p["b2"], 0.0)
    h3 = jnp.maximum(h2 @ p["w3"] + p["b3"], 0.0)
    logits = h3 @ p["w4"] + p["b4"]
    return jax.nn.softmax(logits, axis=1), h2


if __name__ == "__main__":
    key = jax.random.PRNGKey(0)
    k_params, k_x = jax.random.split(key)
    params = init_params(k_params)
    prepped = prepare_params(params)

    B = 8
    x = jax.random.normal(k_x, (B, IN_DIM), jnp.float32)

    out, out2 = jax.jit(k_model_forward)(x, prepped)
    jax.block_until_ready((out, out2))

    ref_out, ref_out2 = reference_forward(x, params)
    assert out.shape == (B, OUT_NODES) and out2.shape == (B, H2)
    # bf16 weights/activations -> relaxed tolerances vs the f32 reference.
    assert jnp.allclose(out, ref_out, atol=3e-2, rtol=3e-2)
    assert jnp.allclose(out2.astype(jnp.float32), ref_out2, atol=5e-2, rtol=5e-2)
    assert jnp.allclose(jnp.sum(out, axis=1), 1.0, atol=1e-3)

    print("KERNEL_OK")
</pallas_src>

<mosaic_0001>
module attributes {stable_mosaic.version = 11 : i64} {
  func.func @mlp_kernel(%arg0: i32, %arg1: memref<16x768xbf16, #tpu.memory_space<vmem>>, %arg2: memref<768x1024xbf16, #tpu.memory_space<vmem>>, %arg3: memref<1x1024xf32, #tpu.memory_space<vmem>>, %arg4: memref<1024x256xbf16, #tpu.memory_space<vmem>>, %arg5: memref<1x256xf32, #tpu.memory_space<vmem>>, %arg6: memref<256x64xbf16, #tpu.memory_space<vmem>>, %arg7: memref<1x64xf32, #tpu.memory_space<vmem>>, %arg8: memref<64x128xbf16, #tpu.memory_space<vmem>>, %arg9: memref<1x128xf32, #tpu.memory_space<vmem>>, %arg10: memref<16x8xf32, #tpu.memory_space<vmem>>, %arg11: memref<16x256xbf16, #tpu.memory_space<vmem>>) attributes {dimension_semantics = [#tpu.dimension_semantics<parallel>], iteration_bounds = array<i64: 1>, scalar_prefetch = 0 : i64, scratch_operands = 0 : i64, tpu.core_type = #tpu.core_type<tc>, window_params = [{transform_indices = @transform_0, window_bounds = array<i64: 16, 768>}, {pipeline_mode = #tpu.pipeline_mode<synchronous>, transform_indices = @transform_1, window_bounds = array<i64: 768, 1024>}, {pipeline_mode = #tpu.pipeline_mode<synchronous>, transform_indices = @transform_2, window_bounds = array<i64: 1, 1024>}, {pipeline_mode = #tpu.pipeline_mode<synchronous>, transform_indices = @transform_3, window_bounds = array<i64: 1024, 256>}, {pipeline_mode = #tpu.pipeline_mode<synchronous>, transform_indices = @transform_4, window_bounds = array<i64: 1, 256>}, {pipeline_mode = #tpu.pipeline_mode<synchronous>, transform_indices = @transform_5, window_bounds = array<i64: 256, 64>}, {pipeline_mode = #tpu.pipeline_mode<synchronous>, transform_indices = @transform_6, window_bounds = array<i64: 1, 64>}, {pipeline_mode = #tpu.pipeline_mode<synchronous>, transform_indices = @transform_7, window_bounds = array<i64: 64, 128>}, {pipeline_mode = #tpu.pipeline_mode<synchronous>, transform_indices = @transform_8, window_bounds = array<i64: 1, 128>}, {transform_indices = @transform_9, window_bounds = array<i64: 16, 8>}, {transform_indices = @transform_10, window_bounds = array<i64: 16, 256>}]} {
    %c0 = arith.constant 0 : index
    %c0_0 = arith.constant 0 : index
    %0 = vector.load %arg1[%c0, %c0_0] : memref<16x768xbf16, #tpu.memory_space<vmem>>, vector<16x768xbf16>
    %c0_1 = arith.constant 0 : index
    %c0_2 = arith.constant 0 : index
    %1 = vector.load %arg2[%c0_1, %c0_2] : memref<768x1024xbf16, #tpu.memory_space<vmem>>, vector<768x1024xbf16>
    %cst = arith.constant dense<0.000000e+00> : vector<16x1024xf32>
    %2 = tpu.matmul %0, %1, %cst {dimension_numbers = #tpu.dot_dimension_numbers<[1], [0], [0], [1], [0, 0, 1, 1], [], []>} : vector<16x768xbf16>, vector<768x1024xbf16>, vector<16x1024xf32> -> vector<16x1024xf32>
    %c0_3 = arith.constant 0 : index
    %c0_4 = arith.constant 0 : index
    %3 = vector.load %arg3[%c0_3, %c0_4] : memref<1x1024xf32, #tpu.memory_space<vmem>>, vector<1x1024xf32>
    %4 = vector.broadcast %3 : vector<1x1024xf32> to vector<16x1024xf32>
    %5 = arith.addf %2, %4 : vector<16x1024xf32>
    %cst_5 = arith.constant 0.000000e+00 : f32
    %6 = vector.broadcast %cst_5 : f32 to vector<16x1024xf32>
    %7 = arith.maximumf %5, %6 : vector<16x1024xf32>
    %8 = arith.truncf %7 : vector<16x1024xf32> to vector<16x1024xbf16>
    %c0_6 = arith.constant 0 : index
    %c0_7 = arith.constant 0 : index
    %9 = vector.load %arg4[%c0_6, %c0_7] : memref<1024x256xbf16, #tpu.memory_space<vmem>>, vector<1024x256xbf16>
    %cst_8 = arith.constant dense<0.000000e+00> : vector<16x256xf32>
    %10 = tpu.matmul %8, %9, %cst_8 {dimension_numbers = #tpu.dot_dimension_numbers<[1], [0], [0], [1], [0, 0, 1, 1], [], []>} : vector<16x1024xbf16>, vector<1024x256xbf16>, vector<16x256xf32> -> vector<16x256xf32>
    %c0_9 = arith.constant 0 : index
    %c0_10 = arith.constant 0 : index
    %11 = vector.load %arg5[%c0_9, %c0_10] : memref<1x256xf32, #tpu.memory_space<vmem>>, vector<1x256xf32>
    %12 = vector.broadcast %11 : vector<1x256xf32> to vector<16x256xf32>
    %13 = arith.addf %10, %12 : vector<16x256xf32>
    %cst_11 = arith.constant 0.000000e+00 : f32
    %14 = vector.broadcast %cst_11 : f32 to vector<16x256xf32>
    %15 = arith.maximumf %13, %14 : vector<16x256xf32>
    %16 = arith.truncf %15 : vector<16x256xf32> to vector<16x256xbf16>
    %c0_12 = arith.constant 0 : index
    %c0_13 = arith.constant 0 : index
    %17 = vector.load %arg11[%c0_12, %c0_13] : memref<16x256xbf16, #tpu.memory_space<vmem>>, vector<16x256xbf16>
    tpu.vector_store %arg11[%c0_12, %c0_13], %16 {strides = array<i32>} : memref<16x256xbf16, #tpu.memory_space<vmem>>, vector<16x256xbf16>,
    %18 = arith.truncf %15 : vector<16x256xf32> to vector<16x256xbf16>
    %c0_14 = arith.constant 0 : index
    %c0_15 = arith.constant 0 : index
    %19 = vector.load %arg6[%c0_14, %c0_15] : memref<256x64xbf16, #tpu.memory_space<vmem>>, vector<256x64xbf16>
    %cst_16 = arith.constant dense<0.000000e+00> : vector<16x64xf32>
    %20 = tpu.matmul %18, %19, %cst_16 {dimension_numbers = #tpu.dot_dimension_numbers<[1], [0], [0], [1], [0, 0, 1, 1], [], []>} : vector<16x256xbf16>, vector<256x64xbf16>, vector<16x64xf32> -> vector<16x64xf32>
    %c0_17 = arith.constant 0 : index
    %c0_18 = arith.constant 0 : index
    %21 = vector.load %arg7[%c0_17, %c0_18] : memref<1x64xf32, #tpu.memory_space<vmem>>, vector<1x64xf32>
    %22 = vector.broadcast %21 : vector<1x64xf32> to vector<16x64xf32>
    %23 = arith.addf %20, %22 : vector<16x64xf32>
    %cst_19 = arith.constant 0.000000e+00 : f32
    %24 = vector.broadcast %cst_19 : f32 to vector<16x64xf32>
    %25 = arith.maximumf %23, %24 : vector<16x64xf32>
    %26 = arith.truncf %25 : vector<16x64xf32> to vector<16x64xbf16>
    %c0_20 = arith.constant 0 : index
    %c0_21 = arith.constant 0 : index
    %27 = vector.load %arg8[%c0_20, %c0_21] : memref<64x128xbf16, #tpu.memory_space<vmem>>, vector<64x128xbf16>
    %cst_22 = arith.constant dense<0.000000e+00> : vector<16x128xf32>
    %28 = tpu.matmul %26, %27, %cst_22 {dimension_numbers = #tpu.dot_dimension_numbers<[1], [0], [0], [1], [0, 0, 1, 1], [], []>} : vector<16x64xbf16>, vector<64x128xbf16>, vector<16x128xf32> -> vector<16x128xf32>
    %c0_23 = arith.constant 0 : index
    %c0_24 = arith.constant 0 : index
    %29 = vector.load %arg9[%c0_23, %c0_24] : memref<1x128xf32, #tpu.memory_space<vmem>>, vector<1x128xf32>
    %30 = vector.broadcast %29 : vector<1x128xf32> to vector<16x128xf32>
    %31 = arith.addf %28, %30 : vector<16x128xf32>
    %cst_25 = arith.constant dense<0xFF800000> : vector<16xf32>
    %32 = vector.multi_reduction <maximumf>, %31, %cst_25 [1] : vector<16x128xf32> to vector<16xf32>
    %33 = vector.shape_cast %32 : vector<16xf32> to vector<16x1xf32>
    %34 = vector.broadcast %33 : vector<16x1xf32> to vector<16x128xf32>
    %35 = arith.subf %31, %34 : vector<16x128xf32>
    %36 = math.exp %35 : vector<16x128xf32>
    %cst_26 = arith.constant dense<0.000000e+00> : vector<16xf32>
    %37 = vector.multi_reduction <add>, %36, %cst_26 [1] : vector<16x128xf32> to vector<16xf32>
    %38 = vector.shape_cast %37 : vector<16xf32> to vector<16x1xf32>
    %39 = vector.broadcast %38 : vector<16x1xf32> to vector<16x128xf32>
    %40 = arith.divf %36, %39 : vector<16x128xf32>
    %41 = vector.extract_strided_slice %40 {offsets = [0, 0], sizes = [16, 8], strides = [1, 1]} : vector<16x128xf32> to vector<16x8xf32>
    %c0_27 = arith.constant 0 : index
    %c0_28 = arith.constant 0 : index
    %42 = vector.load %arg10[%c0_27, %c0_28] : memref<16x8xf32, #tpu.memory_space<vmem>>, vector<16x8xf32>
    tpu.vector_store %arg10[%c0_27, %c0_28], %41 {strides = array<i32>} : memref<16x8xf32, #tpu.memory_space<vmem>>, vector<16x8xf32>,
    return
  }
  func.func @transform_0(%arg0: i32) -> (i32, i32) {
    %c0_i32 = arith.constant 0 : i32
    %c0_i32_0 = arith.constant 0 : i32
    return %arg0, %c0_i32 : i32, i32
  }
  func.func @transform_1(%arg0: i32) -> (i32, i32) {
    %c0_i32 = arith.constant 0 : i32
    %c0_i32_0 = arith.constant 0 : i32
    %c0_i32_1 = arith.constant 0 : i32
    return %c0_i32, %c0_i32_0 : i32, i32
  }
  func.func @transform_2(%arg0: i32) -> (i32, i32) {
    %c0_i32 = arith.constant 0 : i32
    %c0_i32_0 = arith.constant 0 : i32
    %c0_i32_1 = arith.constant 0 : i32
    return %c0_i32, %c0_i32_0 : i32, i32
  }
  func.func @transform_3(%arg0: i32) -> (i32, i32) {
    %c0_i32 = arith.constant 0 : i32
    %c0_i32_0 = arith.constant 0 : i32
    %c0_i32_1 = arith.constant 0 : i32
    return %c0_i32, %c0_i32_0 : i32, i32
  }
  func.func @transform_4(%arg0: i32) -> (i32, i32) {
    %c0_i32 = arith.constant 0 : i32
    %c0_i32_0 = arith.constant 0 : i32
    %c0_i32_1 = arith.constant 0 : i32
    return %c0_i32, %c0_i32_0 : i32, i32
  }
  func.func @transform_5(%arg0: i32) -> (i32, i32) {
    %c0_i32 = arith.constant 0 : i32
    %c0_i32_0 = arith.constant 0 : i32
    %c0_i32_1 = arith.constant 0 : i32
    return %c0_i32, %c0_i32_0 : i32, i32
  }
  func.func @transform_6(%arg0: i32) -> (i32, i32) {
    %c0_i32 = arith.constant 0 : i32
    %c0_i32_0 = arith.constant 0 : i32
    %c0_i32_1 = arith.constant 0 : i32
    return %c0_i32, %c0_i32_0 : i32, i32
  }
  func.func @transform_7(%arg0: i32) -> (i32, i32) {
    %c0_i32 = arith.constant 0 : i32
    %c0_i32_0 = arith.constant 0 : i32
    %c0_i32_1 = arith.constant 0 : i32
    return %c0_i32, %c0_i32_0 : i32, i32
  }
  func.func @transform_8(%arg0: i32) -> (i32, i32) {
    %c0_i32 = arith.constant 0 : i32
    %c0_i32_0 = arith.constant 0 : i32
    %c0_i32_1 = arith.constant 0 : i32
    return %c0_i32, %c0_i32_0 : i32, i32
  }
  func.func @transform_9(%arg0: i32) -> (i32, i32) {
    %c0_i32 = arith.constant 0 : i32
    %c0_i32_0 = arith.constant 0 : i32
    return %arg0, %c0_i32 : i32, i32
  }
  func.func @transform_10(%arg0: i32) -> (i32, i32) {
    %c0_i32 = arith.constant 0 : i32
    %c0_i32_0 = arith.constant 0 : i32
    return %arg0, %c0_i32 : i32, i32
  }
}

</mosaic_0001>

<bundles_post_ra>
// kernel: k_model_forward.1
= control target key start
LH: loop header
LB: loop body
LE: loop exit
PB: predicated region body
PF: predicated region fallthrough
CT: control target
= control target key end

     0   :  { %16 = vsyncpa [#allocation3], 0  ;;  %s5597_s0 = inlined_call_operand.vmem [shape: bf16[16,768], index: 0, kind: input, shape index: {}]   ;;  %s5598_s1 = inlined_call_operand.hbm [shape: bf16[768,1024], index: 1, kind: input, shape index: {}]   ;;  %s5599_s2 = inlined_call_operand.hbm [shape: f32[1,1024], index: 2, kind: input, shape index: {}]   ;;  %s5600_s3 = inlined_call_operand.hbm [shape: bf16[1024,256], index: 3, kind: input, shape index: {}]   ;;  %s5601_s4 = inlined_call_operand.hbm [shape: f32[1,256], index: 4, kind: input, shape index: {}]   ;;  %s5602_s5 = inlined_call_operand.vmem [shape: bf16[256,64], index: 5, kind: input, shape index: {}]   ;;  %s5603_s6 = inlined_call_operand.hbm [shape: f32[1,64], index: 6, kind: input, shape index: {}]   ;;  %s5604_s7 = inlined_call_operand.hbm [shape: bf16[64,128], index: 7, kind: input, shape index: {}]   ;;  %s5605_s8 = inlined_call_operand.hbm [shape: f32[1,128], index: 8, kind: input, shape index: {}]   ;;  %s5606_s9 = inlined_call_operand.vmem [shape: f32[16,8], index: 9, kind: output, shape index: {0}]   ;;  %s5607_s10 = inlined_call_operand.vmem [shape: bf16[16,256], index: 10, kind: output, shape index: {1}]  }
   0x1   :  { %17 = vsyncpa [#allocation5], 0 }
   0x2   :  { %18 = vsyncpa [#allocation8], 0 }
   0x3   :  { %19 = vsyncpa [#allocation11], 0  ;;  %s5294_s13 = smov [#allocation4]   ;;  %s5295_s15 = smov [#allocation7]  }
   0x4   :  { %s40_s14 = sshll.u32 %s5294_s13, 4  ;;  %s62_s16 = sshll.u32 %s5295_s15, 4  ;;  %s41_s14 = int_to_ptr.vmem [resolvable:$true] %s40_s14  ;;  %s63_s16 = int_to_ptr.vmem [resolvable:$true] %s62_s16 }
   0x5   :  { %s5154_s17 = scalar_lea.vmem %s41_s14, 128  ;;  %p5159_p1 = scmp.lt.s32.totalorder %s41_s14, %s41_s14 }
   0x6   :  { %p5155_p0 = scmp.ne.s32.totalorder %s41_s14, %s5154_s17  ;;  %p5160_p2 = scmp.lt.s32.totalorder %s5154_s17, %s5154_s17 }
   0x8   :  { %p5161_p3 = por %p5160_p2, %p5159_p1 }
   0xa   :  { %p5162_p4 = pnand %p5161_p3, %p5155_p0 }
   0xc   :  { %5165 = shalt.err (!%p5162_p4)
}
   0xd   :  { %43 = dma.hbm_to_vmem [thread:$0]  %s5599_s2, 128, %s41_s14, [#allocation5]  }
   0xe   :  { %s5174_s20 = scalar_lea.vmem %s63_s16, 32  ;;  %p5179_p6 = scmp.lt.s32.totalorder %s63_s16, %s63_s16 }
   0xf   :  { %p5175_p5 = scmp.ne.s32.totalorder %s63_s16, %s5174_s20  ;;  %p5180_p7 = scmp.lt.s32.totalorder %s5174_s20, %s5174_s20 }
  0x11   :  { %p5181_p8 = por %p5180_p7, %p5179_p6 }
  0x13   :  { %p5182_p9 = pnand %p5181_p8, %p5175_p5 }
  0x15   :  { %5185 = shalt.err (!%p5182_p9)
}
  0x16   :  { %65 = dma.hbm_to_vmem [thread:$0]  %s5601_s4, 32, %s63_s16, [#allocation8]  }
  0x17   :  { %s5296_s23 = smov [#allocation10]  }
  0x18   :  { %s83_s24 = sshll.u32 %s5296_s23, 4  ;;  %s84_s24 = int_to_ptr.vmem [resolvable:$true] %s83_s24 }
  0x19   :  { %s5194_s25 = scalar_lea.vmem %s84_s24, 512  ;;  %p5199_p11 = scmp.lt.s32.totalorder %s84_s24, %s84_s24 }
  0x1a   :  { %p5195_p10 = scmp.ne.s32.totalorder %s84_s24, %s5194_s25  ;;  %p5200_p12 = scmp.lt.s32.totalorder %s5194_s25, %s5194_s25 }
  0x1c   :  { %p5201_p13 = por %p5200_p12, %p5199_p11 }
  0x1e   :  { %p5202_p0 = pnand %p5201_p13, %p5195_p10 }
  0x20   :  { %5205 = shalt.err (!%p5202_p0)
}
  0x21   :  { %s5297_s2 = smov 64   ;;  %s5298_s26 = smov 4  }
  0x22   :  { %89 = dma.hbm_to_vmem [thread:$0]  %s5604_s7, 512, %s84_s24, [#allocation11], %s5297_s2, %s5297_s2, %s5298_s26  }
  0x23   :  { %s5299_s29 = smov [#allocation2]  }
  0x24   :  { %s27_s30 = sshll.u32 %s5299_s29, 4  ;;  %s28_s30 = int_to_ptr.vmem [resolvable:$true] %s27_s30 }
  0x25   :  { %s5214_s4 = scalar_lea.vmem %s28_s30, 49152  ;;  %p5219_p2 = scmp.lt.s32.totalorder %s28_s30, %s28_s30 }
  0x26   :  { %p5215_p1 = scmp.ne.s32.totalorder %s28_s30, %s5214_s4  ;;  %p5220_p3 = scmp.lt.s32.totalorder %s5214_s4, %s5214_s4 }
  0x28   :  { %p5221_p4 = por %p5220_p3, %p5219_p2 }
  0x2a   :  { %p5222_p5 = pnand %p5221_p4, %p5215_p1 }
  0x2c   :  { %5225 = shalt.err (!%p5222_p5)
}
  0x2d   :  { %s5300_s11 = smov 512   ;;  %s5301_s12 = smov 32  }
  0x2e   :  { %33 = dma.hbm_to_vmem [thread:$0]  %s5598_s1, 49152, %s28_s30, [#allocation3], %s5300_s11, %s5300_s11, %s5301_s12  }
  0x2f   :  { %s5302_s15 = smov [#allocation6]  }
  0x30   :  { %s49_s16 = sshll.u32 %s5302_s15, 4  ;;  %s50_s16 = int_to_ptr.vmem [resolvable:$true] %s49_s16 }
  0x31   :  { %s5234_s7 = scalar_lea.vmem %s50_s16, 16384  ;;  %p5239_p7 = scmp.lt.s32.totalorder %s50_s16, %s50_s16 }
  0x32   :  { %p5235_p6 = scmp.ne.s32.totalorder %s50_s16, %s5234_s7  ;;  %p5240_p8 = scmp.lt.s32.totalorder %s5234_s7, %s5234_s7 }
  0x34   :  { %p5241_p9 = por %p5240_p8, %p5239_p7 }
  0x36   :  { %p5242_p10 = pnand %p5241_p9, %p5235_p6 }
  0x38   :  { %5245 = shalt.err (!%p5242_p10)
}
  0x39   :  { %s5303_s17 = smov 128   ;;  %s5304_s18 = smov 8  }
  0x3a   :  { %55 = dma.hbm_to_vmem [thread:$0]  %s5600_s3, 16384, %s50_s16, [#allocation5], %s5303_s17, %s5303_s17, %s5304_s18  }
  0x3b   :  { %s5305_s21 = smov [#allocation9]   ;;  %s5306_s1 = smov [#allocation12]  }
  0x3c   :  { %s74_s22 = sshll.u32 %s5305_s21, 4  ;;  %s96_s23 = sshll.u32 %s5306_s1, 4  ;;  %s75_s22 = int_to_ptr.vmem [resolvable:$true] %s74_s22  ;;  %s97_s23 = int_to_ptr.vmem [resolvable:$true] %s96_s23 }
  0x3d   :  { %s5254_s24 = scalar_lea.vmem %s75_s22, 16  ;;  %s5258_s25 = scalar_lea.vmem %s75_s22, 32 }
  0x3e   :  { %p5255_p11 = scmp.ne.s32.totalorder %s75_s22, %s5254_s24  ;;  %p5259_p12 = scmp.lt.s32.totalorder %s75_s22, %s75_s22 }
  0x3f   :  { %p5260_p13 = scmp.lt.s32.totalorder %s5258_s25, %s5254_s24 }
  0x41   :  { %p5261_p0 = por %p5260_p13, %p5259_p12 }
  0x43   :  { %p5262_p1 = pnand %p5261_p0, %p5255_p11 }
  0x45   :  { %5265 = shalt.err (!%p5262_p1)
}
  0x46   :  { %77 = dma.hbm_to_vmem [thread:$0]  %s5603_s6, 16, %s75_s22, [#allocation8]  }
  0x47   :  { %s5274_s27 = scalar_lea.vmem %s97_s23, 16  ;;  %s5278_s3 = scalar_lea.vmem %s97_s23, 32 }
  0x48   :  { %p5275_p2 = scmp.ne.s32.totalorder %s97_s23, %s5274_s27  ;;  %p5279_p3 = scmp.lt.s32.totalorder %s97_s23, %s97_s23 }
  0x49   :  { %p5280_p4 = scmp.lt.s32.totalorder %s5278_s3, %s5274_s27 }
  0x4b   :  { %p5281_p5 = por %p5280_p4, %p5279_p3 }
  0x4d   :  { %p5282_p6 = pnand %p5281_p5, %p5275_p2 }
  0x4f   :  { %5285 = shalt.err (!%p5282_p6)
}
  0x50   :  { %99 = dma.hbm_to_vmem [thread:$0]  %s5605_s8, 16, %s97_s23, [#allocation11]  }
  0x51   :  { %5286 = dma.done.wait [#allocation3], 49152  }
  0x52   :  { %5287 = vsyncadd [#allocation3], 4294918144 }
  0x53   :  { %5288 = dma.done.wait [#allocation5], 16512  }
  0x54   :  { %5289 = vsyncadd [#allocation5], 4294950784 }
  0x55   :  { %5290 = dma.done.wait [#allocation8], 48  }
  0x56   :  { %5291 = vsyncadd [#allocation8], 4294967248 }
  0x57   :  { %5292 = dma.done.wait [#allocation11], 528  }
  0x58   :  { %5293 = vsyncadd [#allocation11], 4294966768  ;;  %v184_v0 = vld [vmem:[#allocation2 + $0x1c0] sm:$0xff]  ;;  %vm5308_vm0 = vmmov 0   ;;  %vm4232_vm1 = vcmask 523264   ;;  %vm4295_vm2 = vcmask 64512  }
  0x59   :  { %v188_v1 = vld [vmem:[#allocation2 + $0x1e0] sm:$0xff] }
  0x5a   :  { %v312_v2 = vld [vmem:[#allocation2 + $0x5c0] sm:$0xff]  ;;  %v4373_v3 = vcombine.high %v184_v0, %v188_v1  ;;  %v4372_v5 = vcombine.low %v184_v0, %v188_v1 }
  0x5b   :  { %v316_v4 = vld [vmem:[#allocation2 + $0x5e0] sm:$0xff] }
  0x5c   :  { %v176_v6 = vld [vmem:[#allocation2 + $0x180] sm:$0xff]  ;;  %v4501_v8 = vcombine.high %v312_v2, %v316_v4  ;;  %v4500_v9 = vcombine.low %v312_v2, %v316_v4  ;;  %2504 = vmatprep.subr.bf16.mxu0 %v4373_v3 }
  0x5d   :  { %v180_v7 = vld [vmem:[#allocation2 + $0x1a0] sm:$0xff]  ;;  %2505 = vmatpush1.bf16.msra.mxu0 %v4372_v5 }
  0x5e   :  { %v4365_v10 = vcombine.high %v176_v6, %v180_v7  ;;  %v304_v11 = vld [vmem:[#allocation2 + $0x580] sm:$0xff]  ;;  %2547 = vmatprep.subr.bf16.mxu1 %v4501_v8  ;;  %v4364_v18 = vcombine.low %v176_v6, %v180_v7 }
  0x5f   :  { %v308_v12 = vld [vmem:[#allocation2 + $0x5a0] sm:$0xff]  ;;  %2548 = vmatpush1.bf16.msra.mxu1 %v4500_v9 }
  0x60   :  { %v168_v13 = vld [vmem:[#allocation2 + $0x140] sm:$0xff]  ;;  %v4493_v14 = vcombine.high %v304_v11, %v308_v12  ;;  %2506 = vmatprep.subr.bf16.mxu0 %v4365_v10  ;;  %v4492_v19 = vcombine.low %v304_v11, %v308_v12 }
  0x61   :  { %v172_v15 = vld [vmem:[#allocation2 + $0x160] sm:$0xff]  ;;  %2507 = vmatpush1.bf16.msra.mxu0 %v4364_v18 }
  0x62   :  { %v296_v16 = vld [vmem:[#allocation2 + $0x540] sm:$0xff]  ;;  %v4357_v20 = vcombine.high %v168_v13, %v172_v15  ;;  %2549 = vmatprep.subr.bf16.mxu1 %v4493_v14  ;;  %v4356_v26 = vcombine.low %v168_v13, %v172_v15 }
  0x63   :  { %v300_v17 = vld [vmem:[#allocation2 + $0x560] sm:$0xff]  ;;  %2550 = vmatpush1.bf16.msra.mxu1 %v4492_v19 }
  0x64   :  { %v4485_v21 = vcombine.high %v296_v16, %v300_v17  ;;  %v160_v22 = vld [vmem:[#allocation2 + $0x100] sm:$0xff]  ;;  %2508 = vmatprep.subr.bf16.mxu0 %v4357_v20  ;;  %v4484_v27 = vcombine.low %v296_v16, %v300_v17 }
  0x65   :  { %v164_v23 = vld [vmem:[#allocation2 + $0x120] sm:$0xff]  ;;  %2509 = vmatpush1.bf16.msra.mxu0 %v4356_v26 }
  0x66   :  { %v288_v24 = vld [vmem:[#allocation2 + $0x500] sm:$0xff]  ;;  %v4349_v28 = vcombine.high %v160_v22, %v164_v23  ;;  %2551 = vmatprep.subr.bf16.mxu1 %v4485_v21  ;;  %v4348_v34 = vcombine.low %v160_v22, %v164_v23 }
  0x67   :  { %v292_v25 = vld [vmem:[#allocation2 + $0x520] sm:$0xff]  ;;  %2552 = vmatpush1.bf16.msra.mxu1 %v4484_v27 }
  0x68   :  { %v4477_v29 = vcombine.high %v288_v24, %v292_v25  ;;  %v152_v30 = vld [vmem:[#allocation2 + $0xc0] sm:$0xff]  ;;  %2510 = vmatprep.subr.bf16.mxu0 %v4349_v28  ;;  %v4476_v35 = vcombine.low %v288_v24, %v292_v25 }
  0x69   :  { %v156_v31 = vld [vmem:[#allocation2 + $0xe0] sm:$0xff]  ;;  %2511 = vmatpush1.bf16.msra.mxu0 %v4348_v34 }
  0x6a   :  { %v280_v32 = vld [vmem:[#allocation2 + $0x4c0] sm:$0xff]  ;;  %v4341_v36 = vcombine.high %v152_v30, %v156_v31  ;;  %2553 = vmatprep.subr.bf16.mxu1 %v4477_v29  ;;  %v4340_v42 = vcombine.low %v152_v30, %v156_v31 }
  0x6b   :  { %v284_v33 = vld [vmem:[#allocation2 + $0x4e0] sm:$0xff]  ;;  %2554 = vmatpush1.bf16.msra.mxu1 %v4476_v35 }
  0x6c   :  { %v4469_v37 = vcombine.high %v280_v32, %v284_v33  ;;  %v144_v38 = vld [vmem:[#allocation2 + $0x80] sm:$0xff]  ;;  %2512 = vmatprep.subr.bf16.mxu0 %v4341_v36  ;;  %v4468_v43 = vcombine.low %v280_v32, %v284_v33 }
  0x6d   :  { %v148_v39 = vld [vmem:[#allocation2 + $0xa0] sm:$0xff]  ;;  %2513 = vmatpush1.bf16.msra.mxu0 %v4340_v42 }
  0x6e   :  { %v272_v40 = vld [vmem:[#allocation2 + $0x480] sm:$0xff]  ;;  %v4333_v44 = vcombine.high %v144_v38, %v148_v39  ;;  %2555 = vmatprep.subr.bf16.mxu1 %v4469_v37  ;;  %v4332_v50 = vcombine.low %v144_v38, %v148_v39 }
  0x6f   :  { %v276_v41 = vld [vmem:[#allocation2 + $0x4a0] sm:$0xff]  ;;  %2556 = vmatpush1.bf16.msra.mxu1 %v4468_v43 }
  0x70   :  { %v4461_v45 = vcombine.high %v272_v40, %v276_v41  ;;  %v136_v46 = vld [vmem:[#allocation2 + $0x40] sm:$0xff]  ;;  %2514 = vmatprep.subr.bf16.mxu0 %v4333_v44  ;;  %v4460_v52 = vcombine.low %v272_v40, %v276_v41 }
  0x71   :  { %v140_v47 = vld [vmem:[#allocation2 + $0x60] sm:$0xff]  ;;  %2515 = vmatpush1.bf16.msra.mxu0 %v4332_v50 }
  0x72   :  { %v264_v48 = vld [vmem:[#allocation2 + $0x440] sm:$0xff]  ;;  %v4325_v53 = vcombine.high %v136_v46, %v140_v47  ;;  %2557 = vmatprep.subr.bf16.mxu1 %v4461_v45  ;;  %v4324_v60 = vcombine.low %v136_v46, %v140_v47 }
  0x73   :  { %v268_v49 = vld [vmem:[#allocation2 + $0x460] sm:$0xff]  ;;  %2558 = vmatpush1.bf16.msra.mxu1 %v4460_v52 }
  0x74   :  { %v128_v51 = vld [vmem:[#allocation2] sm:$0xff]  ;;  %v4453_v55 = vcombine.high %v264_v48, %v268_v49  ;;  %2516 = vmatprep.subr.bf16.mxu0 %v4325_v53  ;;  %v4452_v61 = vcombine.low %v264_v48, %v268_v49 }
  0x75   :  { %v132_v54 = vld [vmem:[#allocation2 + $0x20] sm:$0xff]  ;;  %2517 = vmatpush1.bf16.msra.mxu0 %v4324_v60 }
  0x76   :  { %v5388_v56 = vld [vmem:[%s5597_s0 + $0x4] ss:$24 sps:$4 sm:$0xff]   ;;  %v4317_v62 = vcombine.high %v128_v51, %v132_v54  ;;  %2559 = vmatprep.subr.bf16.mxu1 %v4453_v55  ;;  %v4316_v4 = vcombine.low %v128_v51, %v132_v54 }
  0x77   :  { %v256_v57 = vld [vmem:[#allocation2 + $0x400] sm:$0xff]  ;;  %2536 = vmatprep.mubr.bf16.mxu0 %v5388_v56  ;;  %2560 = vmatpush1.bf16.msra.mxu1 %v4452_v61 }
  0x78   :  { %v260_v58 = vld [vmem:[#allocation2 + $0x420] sm:$0xff]  ;;  %2518 = vmatprep.subr.bf16.mxu0 %v4317_v62 }
  0x79   :  { %v5393_v59 = vld [vmem:[%s5597_s0 + $0xc] ss:$24 sps:$4 sm:$0xff]   ;;  %v4445_v63 = vcombine.high %v256_v57, %v260_v58  ;;  %v4444_v5 = vcombine.low %v256_v57, %v260_v58  ;;  %2519 = vmatpush1.bf16.msra.mxu0 %v4316_v4 }
  0x7a   :  { %v248_v0 = vld [vmem:[#allocation2 + $0x3c0] sm:$0xff]  ;;  %2579 = vmatprep.mubr.bf16.mxu1 %v5393_v59  ;;  %v185_v4 = vld [vmem:[#allocation2 + $0x1c8] sm:$0xff] }
  0x7b   :  { %v252_v1 = vld [vmem:[#allocation2 + $0x3e0] sm:$0xff]  ;;  %2561 = vmatprep.subr.bf16.mxu1 %v4445_v63 }
  0x7c   :  { %v376_v2 = vld [vmem:[#allocation2 + $0x7c0] sm:$0xff]  ;;  %v4437_v6 = vcombine.high %v248_v0, %v252_v1  ;;  %v4436_v12 = vcombine.low %v248_v0, %v252_v1  ;;  %2562 = vmatpush1.bf16.msra.mxu1 %v4444_v5  ;;  %v189_v5 = vld [vmem:[#allocation2 + $0x1e8] sm:$0xff] }
  0x7d   :  { %v380_v3 = vld [vmem:[#allocation2 + $0x7e0] sm:$0xff] }
  0x7e   :  { %v4565_v7 = vcombine.high %v376_v2, %v380_v3  ;;  %v240_v8 = vld [vmem:[#allocation2 + $0x380] sm:$0xff]  ;;  %2520 = vmatprep.subr.bf16.mxu0 %v4437_v6  ;;  %v4564_v13 = vcombine.low %v376_v2, %v380_v3 }
  0x7f   :  { %v244_v9 = vld [vmem:[#allocation2 + $0x3a0] sm:$0xff]  ;;  %2521 = vmatpush2.bf16.msra.mxu0 %v4436_v12 }
  0x80   :  { %v368_v10 = vld [vmem:[#allocation2 + $0x780] sm:$0xff]  ;;  %v4429_v14 = vcombine.high %v240_v8, %v244_v9  ;;  %2563 = vmatprep.subr.bf16.mxu1 %v4565_v7  ;;  %v4428_v20 = vcombine.low %v240_v8, %v244_v9  ;;  %v4375_v9 = vcombine.high %v185_v4, %v189_v5 }
  0x81   :  { %v372_v11 = vld [vmem:[#allocation2 + $0x7a0] sm:$0xff]  ;;  %2564 = vmatpush2.bf16.msra.mxu1 %v4564_v13  ;;  %v177_v13 = vld [vmem:[#allocation2 + $0x188] sm:$0xff] }
  0x82   :  { %v4557_v15 = vcombine.high %v368_v10, %v372_v11  ;;  %v232_v16 = vld [vmem:[#allocation2 + $0x340] sm:$0xff]  ;;  %2522 = vmatprep.subr.bf16.mxu0 %v4429_v14  ;;  %v4556_v21 = vcombine.low %v368_v10, %v372_v11  ;;  %v181_v14 = vld [vmem:[#allocation2 + $0x1a8] sm:$0xff] }
  0x83   :  { %v236_v17 = vld [vmem:[#allocation2 + $0x360] sm:$0xff]  ;;  %2523 = vmatpush2.bf16.msra.mxu0 %v4428_v20 }
  0x84   :  { %v360_v18 = vld [vmem:[#allocation2 + $0x740] sm:$0xff]  ;;  %v4421_v22 = vcombine.high %v232_v16, %v236_v17  ;;  %2565 = vmatprep.subr.bf16.mxu1 %v4557_v15  ;;  %v4420_v28 = vcombine.low %v232_v16, %v236_v17  ;;  %v4374_v17 = vcombine.low %v185_v4, %v189_v5 }
  0x85   :  { %v364_v19 = vld [vmem:[#allocation2 + $0x760] sm:$0xff]  ;;  %2566 = vmatpush2.bf16.msra.mxu1 %v4556_v21 }
  0x86   :  { %v4549_v23 = vcombine.high %v360_v18, %v364_v19  ;;  %v224_v24 = vld [vmem:[#allocation2 + $0x300] sm:$0xff]  ;;  %2524 = vmatprep.subr.bf16.mxu0 %v4421_v22  ;;  %v4548_v29 = vcombine.low %v360_v18, %v364_v19  ;;  %v4367_v19 = vcombine.high %v177_v13, %v181_v14  ;;  %v5408_v22 = vld [vmem:[%s5597_s0 + $0x14] ss:$24 sps:$4 sm:$0xff]  }
  0x87   :  { %v228_v25 = vld [vmem:[#allocation2 + $0x320] sm:$0xff]  ;;  %2525 = vmatpush2.bf16.msra.mxu0 %v4420_v28 }
  0x88   :  { %v352_v26 = vld [vmem:[#allocation2 + $0x700] sm:$0xff]  ;;  %v4413_v30 = vcombine.high %v224_v24, %v228_v25  ;;  %2567 = vmatprep.subr.bf16.mxu1 %v4549_v23  ;;  %v4412_v36 = vcombine.low %v224_v24, %v228_v25  ;;  %v169_v23 = vld [vmem:[#allocation2 + $0x148] sm:$0xff] }
  0x89   :  { %v356_v27 = vld [vmem:[#allocation2 + $0x720] sm:$0xff]  ;;  %2568 = vmatpush2.bf16.msra.mxu1 %v4548_v29  ;;  %v173_v24 = vld [vmem:[#allocation2 + $0x168] sm:$0xff] }
  0x8a   :  { %v4541_v31 = vcombine.high %v352_v26, %v356_v27  ;;  %v216_v32 = vld [vmem:[#allocation2 + $0x2c0] sm:$0xff]  ;;  %2526 = vmatprep.subr.bf16.mxu0 %v4413_v30  ;;  %v4540_v37 = vcombine.low %v352_v26, %v356_v27  ;;  %v4366_v26 = vcombine.low %v177_v13, %v181_v14  ;;  %v4359_v30 = vcombine.high %v169_v23, %v173_v24 }
  0x8b   :  { %v220_v33 = vld [vmem:[#allocation2 + $0x2e0] sm:$0xff]  ;;  %2527 = vmatpush2.bf16.msra.mxu0 %v4412_v36 }
  0x8c   :  { %v344_v34 = vld [vmem:[#allocation2 + $0x6c0] sm:$0xff]  ;;  %v4405_v38 = vcombine.high %v216_v32, %v220_v33  ;;  %2569 = vmatprep.subr.bf16.mxu1 %v4541_v31  ;;  %v4404_v44 = vcombine.low %v216_v32, %v220_v33  ;;  %v161_v31 = vld [vmem:[#allocation2 + $0x108] sm:$0xff] }
  0x8d   :  { %v348_v35 = vld [vmem:[#allocation2 + $0x6e0] sm:$0xff]  ;;  %2570 = vmatpush2.bf16.msra.mxu1 %v4540_v37  ;;  %v165_v32 = vld [vmem:[#allocation2 + $0x128] sm:$0xff] }
  0x8e   :  { %v4533_v39 = vcombine.high %v344_v34, %v348_v35  ;;  %v208_v40 = vld [vmem:[#allocation2 + $0x280] sm:$0xff]  ;;  %2528 = vmatprep.subr.bf16.mxu0 %v4405_v38  ;;  %v4532_v45 = vcombine.low %v344_v34, %v348_v35  ;;  %v4358_v34 = vcombine.low %v169_v23, %v173_v24  ;;  %v153_v38 = vld [vmem:[#allocation2 + $0xc8] sm:$0xff] }
  0x8f   :  { %v212_v41 = vld [vmem:[#allocation2 + $0x2a0] sm:$0xff]  ;;  %2529 = vmatpush2.bf16.msra.mxu0 %v4404_v44 }
  0x90   :  { %v336_v42 = vld [vmem:[#allocation2 + $0x680] sm:$0xff]  ;;  %v4397_v46 = vcombine.high %v208_v40, %v212_v41  ;;  %2571 = vmatprep.subr.bf16.mxu1 %v4533_v39  ;;  %v4396_v52 = vcombine.low %v208_v40, %v212_v41  ;;  %v4351_v39 = vcombine.high %v161_v31, %v165_v32  ;;  %v157_v40 = vld [vmem:[#allocation2 + $0xe8] sm:$0xff] }
  0x91   :  { %v340_v43 = vld [vmem:[#allocation2 + $0x6a0] sm:$0xff]  ;;  %2572 = vmatpush2.bf16.msra.mxu1 %v4532_v45  ;;  %v145_v45 = vld [vmem:[#allocation2 + $0x88] sm:$0xff] }
  0x92   :  { %v4525_v47 = vcombine.high %v336_v42, %v340_v43  ;;  %v200_v48 = vld [vmem:[#allocation2 + $0x240] sm:$0xff]  ;;  %2530 = vmatprep.subr.bf16.mxu0 %v4397_v46  ;;  %v4524_v53 = vcombine.low %v336_v42, %v340_v43  ;;  %v4350_v42 = vcombine.low %v161_v31, %v165_v32  ;;  %v4343_v46 = vcombine.high %v153_v38, %v157_v40 }
  0x93   :  { %v204_v49 = vld [vmem:[#allocation2 + $0x260] sm:$0xff]  ;;  %2531 = vmatpush2.bf16.msra.mxu0 %v4396_v52 }
  0x94   :  { %v328_v50 = vld [vmem:[#allocation2 + $0x640] sm:$0xff]  ;;  %v4389_v54 = vcombine.high %v200_v48, %v204_v49  ;;  %2573 = vmatprep.subr.bf16.mxu1 %v4525_v47  ;;  %v4388_v62 = vcombine.low %v200_v48, %v204_v49  ;;  %v149_v47 = vld [vmem:[#allocation2 + $0xa8] sm:$0xff]  ;;  %v4342_v49 = vcombine.low %v153_v38, %v157_v40 }
  0x95   :  { %v332_v51 = vld [vmem:[#allocation2 + $0x660] sm:$0xff]  ;;  %2574 = vmatpush2.bf16.msra.mxu1 %v4524_v53  ;;  %v137_v53 = vld [vmem:[#allocation2 + $0x48] sm:$0xff] }
  0x96   :  { %v4517_v55 = vcombine.high %v328_v50, %v332_v51  ;;  %v192_v57 = vld [vmem:[#allocation2 + $0x200] sm:$0xff]  ;;  %2532 = vmatprep.subr.bf16.mxu0 %v4389_v54  ;;  %v4516_v63 = vcombine.low %v328_v50, %v332_v51  ;;  %v4335_v54 = vcombine.high %v145_v45, %v149_v47 }
  0x97   :  { %v196_v58 = vld [vmem:[#allocation2 + $0x220] sm:$0xff]  ;;  %2533 = vmatpush2.bf16.msra.mxu0 %v4388_v62 }
  0x98   :  { %v320_v60 = vld [vmem:[#allocation2 + $0x600] sm:$0xff]  ;;  %v4381_v0 = vcombine.high %v192_v57, %v196_v58  ;;  %2575 = vmatprep.subr.bf16.mxu1 %v4517_v55  ;;  %v4380_v6 = vcombine.low %v192_v57, %v196_v58  ;;  %v141_v55 = vld [vmem:[#allocation2 + $0x68] sm:$0xff]  ;;  %v4334_v58 = vcombine.low %v145_v45, %v149_v47 }
  0x99   :  { %v324_v61 = vld [vmem:[#allocation2 + $0x620] sm:$0xff]  ;;  %2576 = vmatpush2.bf16.msra.mxu1 %v4516_v63  ;;  %v129_v63 = vld [vmem:[#allocation2 + $0x8] sm:$0xff] }
  0x9a   :  { %v4509_v1 = vcombine.high %v320_v60, %v324_v61  ;;  %v440_v2 = vld [vmem:[#allocation2 + $0x9c0] sm:$0xff]  ;;  %2534 = vmatprep.subr.bf16.mxu0 %v4381_v0  ;;  %v4508_v7 = vcombine.low %v320_v60, %v324_v61  ;;  %v4327_v0 = vcombine.high %v137_v53, %v141_v55 }
  0x9b   :  { %v444_v3 = vld [vmem:[#allocation2 + $0x9e0] sm:$0xff]  ;;  %2535 = vmatpush2.bf16.msra.mxu0 %v4380_v6 }
  0x9c   :  { %v4629_v8 = vcombine.high %v440_v2, %v444_v3  ;;  %2577 = vmatprep.subr.bf16.mxu1 %v4509_v1  ;;  %v432_v10 = vld [vmem:[#allocation2 + $0x980] sm:$0xff]  ;;  %v4628_v16 = vcombine.low %v440_v2, %v444_v3  ;;  %v133_v1 = vld [vmem:[#allocation2 + $0x28] sm:$0xff]  ;;  %v4326_v3 = vcombine.low %v137_v53, %v141_v55 }
  0x9d   :  { %v436_v11 = vld [vmem:[#allocation2 + $0x9a0] sm:$0xff]  ;;  %2578 = vmatpush2.bf16.msra.mxu1 %v4508_v7  ;;  %v249_v7 = vld [vmem:[#allocation2 + $0x3c8] sm:$0xff] }
  0x9e   :  { %v5400_v12 = vld [vmem:[%s5597_s0] ss:$24 sps:$4 sm:$0xff]   ;;  %2590 = vmatprep.subr.bf16.mxu0 %v4629_v8  ;;  %v4621_v18 = vcombine.high %v432_v10, %v436_v11  ;;  %2633 = vmatprep.subr.bf16.mxu1 %v4375_v9  ;;  %v4620_v25 = vcombine.low %v432_v10, %v436_v11  ;;  %v4319_v8 = vcombine.high %v129_v63, %v133_v1  ;;  %v253_v9 = vld [vmem:[#allocation2 + $0x3e8] sm:$0xff] }
  0x9f   :  { %v4914_v15 = vld [vmem:[%s5597_s0 + $0x8] ss:$24 sps:$4 sm:$0xff]   ;;  %2537 = vmatmul.mubr.bf16.vlgmr.msra.gmra.mxu0 %v5400_v12  ;;  %v4318_v11 = vcombine.low %v129_v63, %v133_v1 }
  0xa0   :  { %v424_v20 = vld [vmem:[#allocation2 + $0x940] sm:$0xff]  ;;  %2580 = vmatmul.mubr.bf16.vlgmr.msra.gmra.mxu1 %v4914_v15  ;;  %2591 = vmatpush1.bf16.msra.mxu0 %v4628_v16  ;;  %v241_v16 = vld [vmem:[#allocation2 + $0x388] sm:$0xff] }
  0xa1   :  { %v428_v21 = vld [vmem:[#allocation2 + $0x960] sm:$0xff]  ;;  %2634 = vmatpush1.bf16.msra.mxu1 %v4374_v17  ;;  %2592 = vmatprep.subr.bf16.mxu0 %v4621_v18  ;;  %v4439_v17 = vcombine.high %v249_v7, %v253_v9  ;;  %v245_v18 = vld [vmem:[#allocation2 + $0x3a8] sm:$0xff] }
  0xa2   :  { %v4613_v27 = vcombine.high %v424_v20, %v428_v21  ;;  %v416_v28 = vld [vmem:[#allocation2 + $0x900] sm:$0xff]  ;;  %2635 = vmatprep.subr.bf16.mxu1 %v4367_v19  ;;  %2622 = vmatprep.mubr.bf16.mxu0 %v5408_v22  ;;  %v4612_v33 = vcombine.low %v424_v20, %v428_v21  ;;  %v4438_v20 = vcombine.low %v249_v7, %v253_v9  ;;  %v317_v9 = vld [vmem:[#allocation2 + $0x5e8] sm:$0xff] }
  0xa3   :  { %v420_v29 = vld [vmem:[#allocation2 + $0x920] sm:$0xff]  ;;  %2665 = vmatprep.mubr.bf16.mxu1 %v5388_v56 }
  0xa4   :  { %2593 = vmatpush1.bf16.msra.mxu0 %v4620_v25  ;;  %v4605_v35 = vcombine.high %v416_v28, %v420_v29  ;;  %v408_v36 = vld [vmem:[#allocation2 + $0x8c0] sm:$0xff]  ;;  %v4604_v41 = vcombine.low %v416_v28, %v420_v29  ;;  %v233_v25 = vld [vmem:[#allocation2 + $0x348] sm:$0xff]  ;;  %v4430_v29 = vcombine.low %v241_v16, %v245_v18 }
  0xa5   :  { %2636 = vmatpush1.bf16.msra.mxu1 %v4366_v26  ;;  %2594 = vmatprep.subr.bf16.mxu0 %v4613_v27  ;;  %v412_v37 = vld [vmem:[#allocation2 + $0x8e0] sm:$0xff]  ;;  %v4431_v26 = vcombine.high %v241_v16, %v245_v18  ;;  %v237_v27 = vld [vmem:[#allocation2 + $0x368] sm:$0xff] }
  0xa6   :  { %2637 = vmatprep.subr.bf16.mxu1 %v4359_v30  ;;  %v4597_v43 = vcombine.high %v408_v36, %v412_v37  ;;  %v400_v44 = vld [vmem:[#allocation2 + $0x880] sm:$0xff]  ;;  %v4596_v48 = vcombine.low %v408_v36, %v412_v37  ;;  %v4422_v37 = vcombine.low %v233_v25, %v237_v27  ;;  %v5416_v16 = vld [vmem:[%s5597_s0 + $0x10] ss:$24 sps:$4 sm:$0xff]  }
  0xa7   :  { %v404_v56 = vld [vmem:[#allocation2 + $0x8a0] sm:$0xff]  ;;  %v305_v18 = vld [vmem:[#allocation2 + $0x588] sm:$0xff] }
  0xa8   :  { %2595 = vmatpush1.bf16.msra.mxu0 %v4612_v33  ;;  %v4589_v50 = vcombine.high %v400_v44, %v404_v56  ;;  %v392_v51 = vld [vmem:[#allocation2 + $0x840] sm:$0xff]  ;;  %v4588_v57 = vcombine.low %v400_v44, %v404_v56  ;;  %v225_v33 = vld [vmem:[#allocation2 + $0x308] sm:$0xff] }
  0xa9   :  { %2638 = vmatpush1.bf16.msra.mxu1 %v4358_v34  ;;  %2596 = vmatprep.subr.bf16.mxu0 %v4605_v35  ;;  %v396_v52 = vld [vmem:[#allocation2 + $0x860] sm:$0xff]  ;;  %v4423_v34 = vcombine.high %v233_v25, %v237_v27  ;;  %v229_v35 = vld [vmem:[#allocation2 + $0x328] sm:$0xff] }
  0xaa   :  { %2639 = vmatprep.subr.bf16.mxu1 %v4351_v39  ;;  %v4581_v60 = vcombine.high %v392_v51, %v396_v52  ;;  %v384_v61 = vld [vmem:[#allocation2 + $0x800] sm:$0xff]  ;;  %v4580_v2 = vcombine.low %v392_v51, %v396_v52  ;;  %v4414_v56 = vcombine.low %v225_v33, %v229_v35  ;;  %v297_v27 = vld [vmem:[#allocation2 + $0x548] sm:$0xff] }
  0xab   :  { %v388_v62 = vld [vmem:[#allocation2 + $0x820] sm:$0xff] }
  0xac   :  { %2597 = vmatpush1.bf16.msra.mxu0 %v4604_v41  ;;  %v4573_v4 = vcombine.high %v384_v61, %v388_v62  ;;  %v504_v5 = vld [vmem:[#allocation2 + $0xbc0] sm:$0xff]  ;;  %v4572_v10 = vcombine.low %v384_v61, %v388_v62  ;;  %v217_v41 = vld [vmem:[#allocation2 + $0x2c8] sm:$0xff] }
  0xad   :  { %2640 = vmatpush1.bf16.msra.mxu1 %v4350_v42  ;;  %2598 = vmatprep.subr.bf16.mxu0 %v4597_v43  ;;  %v508_v6 = vld [vmem:[#allocation2 + $0xbe0] sm:$0xff]  ;;  %v4415_v42 = vcombine.high %v225_v33, %v229_v35  ;;  %v221_v43 = vld [vmem:[#allocation2 + $0x2e8] sm:$0xff] }
  0xae   :  { %2641 = vmatprep.subr.bf16.mxu1 %v4343_v46  ;;  %v4693_v13 = vcombine.high %v504_v5, %v508_v6  ;;  %v496_v14 = vld [vmem:[#allocation2 + $0xb80] sm:$0xff]  ;;  %v4692_v19 = vcombine.low %v504_v5, %v508_v6  ;;  %v4406_v52 = vcombine.low %v217_v41, %v221_v43  ;;  %v289_v35 = vld [vmem:[#allocation2 + $0x508] sm:$0xff] }
  0xaf   :  { %v500_v15 = vld [vmem:[#allocation2 + $0xba0] sm:$0xff] }
  0xb0   :  { %2599 = vmatpush1.bf16.msra.mxu0 %v4596_v48  ;;  %v4685_v21 = vcombine.high %v496_v14, %v500_v15  ;;  %v488_v23 = vld [vmem:[#allocation2 + $0xb40] sm:$0xff]  ;;  %v4684_v28 = vcombine.low %v496_v14, %v500_v15  ;;  %v209_v48 = vld [vmem:[#allocation2 + $0x288] sm:$0xff] }
  0xb1   :  { %2642 = vmatpush1.bf16.msra.mxu1 %v4342_v49  ;;  %2600 = vmatprep.subr.bf16.mxu0 %v4589_v50  ;;  %v492_v24 = vld [vmem:[#allocation2 + $0xb60] sm:$0xff]  ;;  %v4407_v49 = vcombine.high %v217_v41, %v221_v43  ;;  %v213_v50 = vld [vmem:[#allocation2 + $0x2a8] sm:$0xff] }
  0xb2   :  { %2643 = vmatprep.subr.bf16.mxu1 %v4335_v54  ;;  %v4677_v30 = vcombine.high %v488_v23, %v492_v24  ;;  %v480_v31 = vld [vmem:[#allocation2 + $0xb00] sm:$0xff]  ;;  %v4676_v36 = vcombine.low %v488_v23, %v492_v24  ;;  %v4398_v62 = vcombine.low %v209_v48, %v213_v50  ;;  %v437_v23 = vld [vmem:[#allocation2 + $0x9a8] sm:$0xff] }
  0xb3   :  { %v484_v32 = vld [vmem:[#allocation2 + $0xb20] sm:$0xff]  ;;  %v285_v43 = vld [vmem:[#allocation2 + $0x4e8] sm:$0xff] }
  0xb4   :  { %2601 = vmatpush1.bf16.msra.mxu0 %v4588_v57  ;;  %v4669_v38 = vcombine.high %v480_v31, %v484_v32  ;;  %v472_v39 = vld [vmem:[#allocation2 + $0xac0] sm:$0xff]  ;;  %v4668_v44 = vcombine.low %v480_v31, %v484_v32  ;;  %v201_v57 = vld [vmem:[#allocation2 + $0x248] sm:$0xff] }
  0xb5   :  { %2644 = vmatpush1.bf16.msra.mxu1 %v4334_v58  ;;  %2602 = vmatprep.subr.bf16.mxu0 %v4581_v60  ;;  %v476_v40 = vld [vmem:[#allocation2 + $0xae0] sm:$0xff]  ;;  %v4399_v58 = vcombine.high %v209_v48, %v213_v50  ;;  %v205_v60 = vld [vmem:[#allocation2 + $0x268] sm:$0xff] }
  0xb6   :  { %2645 = vmatprep.subr.bf16.mxu1 %v4327_v0  ;;  %v4661_v45 = vcombine.high %v472_v39, %v476_v40  ;;  %v464_v46 = vld [vmem:[#allocation2 + $0xa80] sm:$0xff]  ;;  %v4660_v51 = vcombine.low %v472_v39, %v476_v40  ;;  %v4390_v6 = vcombine.low %v201_v57, %v205_v60  ;;  %v429_v31 = vld [vmem:[#allocation2 + $0x968] sm:$0xff] }
  0xb7   :  { %v468_v47 = vld [vmem:[#allocation2 + $0xaa0] sm:$0xff]  ;;  %v421_v39 = vld [vmem:[#allocation2 + $0x928] sm:$0xff] }
  0xb8   :  { %2603 = vmatpush1.bf16.msra.mxu0 %v4580_v2  ;;  %v4653_v53 = vcombine.high %v464_v46, %v468_v47  ;;  %v456_v54 = vld [vmem:[#allocation2 + $0xa40] sm:$0xff]  ;;  %v4652_v61 = vcombine.low %v464_v46, %v468_v47  ;;  %v193_v2 = vld [vmem:[#allocation2 + $0x208] sm:$0xff] }
  0xb9   :  { %2646 = vmatpush1.bf16.msra.mxu1 %v4326_v3  ;;  %2604 = vmatprep.subr.bf16.mxu0 %v4573_v4  ;;  %v460_v55 = vld [vmem:[#allocation2 + $0xa60] sm:$0xff]  ;;  %v4391_v3 = vcombine.high %v201_v57, %v205_v60  ;;  %v197_v4 = vld [vmem:[#allocation2 + $0x228] sm:$0xff] }
  0xba   :  { %2647 = vmatprep.subr.bf16.mxu1 %v4319_v8  ;;  %v4645_v63 = vcombine.high %v456_v54, %v460_v55  ;;  %v448_v0 = vld [vmem:[#allocation2 + $0xa00] sm:$0xff]  ;;  %v4644_v5 = vcombine.low %v456_v54, %v460_v55  ;;  %v313_v8 = vld [vmem:[#allocation2 + $0x5c8] sm:$0xff]  ;;  %v4382_v15 = vcombine.low %v193_v2, %v197_v4 }
  0xbb   :  { %v452_v1 = vld [vmem:[#allocation2 + $0xa20] sm:$0xff]  ;;  %v4502_v24 = vcombine.low %v313_v8, %v317_v9  ;;  %v273_v48 = vld [vmem:[#allocation2 + $0x488] sm:$0xff] }
  0xbc   :  { %2605 = vmatpush1.bf16.msra.mxu0 %v4572_v10  ;;  %v4637_v7 = vcombine.high %v448_v0, %v452_v1  ;;  %v441_v10 = vld [vmem:[#allocation2 + $0x9c8] sm:$0xff]  ;;  %v4636_v14 = vcombine.low %v448_v0, %v452_v1 }
  0xbd   :  { %2648 = vmatpush1.bf16.msra.mxu1 %v4318_v11  ;;  %2606 = vmatprep.subr.bf16.mxu0 %v4693_v13  ;;  %v4383_v11 = vcombine.high %v193_v2, %v197_v4  ;;  %v445_v13 = vld [vmem:[#allocation2 + $0x9e8] sm:$0xff] }
  0xbe   :  { %2649 = vmatprep.subr.bf16.mxu1 %v4439_v17  ;;  %v4503_v17 = vcombine.high %v313_v8, %v317_v9  ;;  %v4630_v25 = vcombine.low %v441_v10, %v445_v13  ;;  %v265_v55 = vld [vmem:[#allocation2 + $0x448] sm:$0xff] }
  0xbf   :  { %v269_v57 = vld [vmem:[#allocation2 + $0x468] sm:$0xff] }
  0xc0   :  { %2607 = vmatpush2.bf16.msra.mxu0 %v4692_v19  ;;  %v309_v19 = vld [vmem:[#allocation2 + $0x5a8] sm:$0xff]  ;;  %v4455_v0 = vcombine.high %v265_v55, %v269_v57 }
  0xc1   :  { %2650 = vmatpush2.bf16.msra.mxu1 %v4438_v20  ;;  %2608 = vmatprep.subr.bf16.mxu0 %v4685_v21  ;;  %v433_v20 = vld [vmem:[#allocation2 + $0x988] sm:$0xff]  ;;  %v4631_v21 = vcombine.high %v441_v10, %v445_v13  ;;  %v4494_v32 = vcombine.low %v305_v18, %v309_v19 }
  0xc2   :  { %2651 = vmatprep.subr.bf16.mxu1 %v4431_v26  ;;  %v4495_v26 = vcombine.high %v305_v18, %v309_v19  ;;  %v4622_v33 = vcombine.low %v433_v20, %v437_v23  ;;  %v257_v1 = vld [vmem:[#allocation2 + $0x408] sm:$0xff] }
  0xc3   :  { %v261_v2 = vld [vmem:[#allocation2 + $0x428] sm:$0xff] }
  0xc4   :  { %2609 = vmatpush2.bf16.msra.mxu0 %v4684_v28  ;;  %v301_v28 = vld [vmem:[#allocation2 + $0x568] sm:$0xff]  ;;  %v4447_v8 = vcombine.high %v257_v1, %v261_v2 }
  0xc5   :  { %2652 = vmatpush2.bf16.msra.mxu1 %v4430_v29  ;;  %2610 = vmatprep.subr.bf16.mxu0 %v4677_v30  ;;  %v4623_v29 = vcombine.high %v433_v20, %v437_v23  ;;  %v425_v30 = vld [vmem:[#allocation2 + $0x948] sm:$0xff]  ;;  %v4486_v40 = vcombine.low %v297_v27, %v301_v28 }
  0xc6   :  { %2653 = vmatprep.subr.bf16.mxu1 %v4423_v34  ;;  %v4487_v34 = vcombine.high %v297_v27, %v301_v28  ;;  %v377_v9 = vld [vmem:[#allocation2 + $0x7c8] sm:$0xff] }
  0xc7   :  { %v505_v13 = vld [vmem:[#allocation2 + $0xbc8] sm:$0xff] }
  0xc8   :  { %2611 = vmatpush2.bf16.msra.mxu0 %v4676_v36  ;;  %v293_v36 = vld [vmem:[#allocation2 + $0x528] sm:$0xff] }
  0xc9   :  { %2654 = vmatpush2.bf16.msra.mxu1 %v4422_v37  ;;  %2612 = vmatprep.subr.bf16.mxu0 %v4669_v38  ;;  %v417_v37 = vld [vmem:[#allocation2 + $0x908] sm:$0xff]  ;;  %v4615_v38 = vcombine.high %v425_v30, %v429_v31  ;;  %v4479_v41 = vcombine.high %v289_v35, %v293_v36  ;;  %v4478_v46 = vcombine.low %v289_v35, %v293_v36 }
  0xca   :  { %2655 = vmatprep.subr.bf16.mxu1 %v4415_v42  ;;  %v281_v42 = vld [vmem:[#allocation2 + $0x4c8] sm:$0xff]  ;;  %v4606_v47 = vcombine.low %v417_v37, %v421_v39 }
  0xcb   :  { %v369_v20 = vld [vmem:[#allocation2 + $0x788] sm:$0xff] }
  0xcc   :  { %2613 = vmatpush2.bf16.msra.mxu0 %v4668_v44  ;;  %v409_v44 = vld [vmem:[#allocation2 + $0x8c8] sm:$0xff] }
  0xcd   :  { %2656 = vmatpush2.bf16.msra.mxu1 %v4414_v56  ;;  %2614 = vmatprep.subr.bf16.mxu0 %v4661_v45  ;;  %v4607_v56 = vcombine.high %v417_v37, %v421_v39  ;;  %v413_v45 = vld [vmem:[#allocation2 + $0x8e8] sm:$0xff] }
  0xce   :  { %2657 = vmatprep.subr.bf16.mxu1 %v4407_v49  ;;  %v401_v49 = vld [vmem:[#allocation2 + $0x888] sm:$0xff]  ;;  %v4599_v50 = vcombine.high %v409_v44, %v413_v45 }
  0xcf   :  { %v497_v23 = vld [vmem:[#allocation2 + $0xb88] sm:$0xff] }
  0xd0   :  { %2615 = vmatpush2.bf16.msra.mxu0 %v4660_v51  ;;  %v405_v51 = vld [vmem:[#allocation2 + $0x8a8] sm:$0xff] }
  0xd1   :  { %2658 = vmatpush2.bf16.msra.mxu1 %v4406_v52  ;;  %2616 = vmatprep.subr.bf16.mxu0 %v4653_v53  ;;  %v4470_v52 = vcombine.low %v281_v42, %v285_v43  ;;  %v4598_v53 = vcombine.low %v409_v44, %v413_v45  ;;  %v4591_v60 = vcombine.high %v401_v49, %v405_v51  ;;  %v353_v37 = vld [vmem:[#allocation2 + $0x708] sm:$0xff] }
  0xd2   :  { %2659 = vmatprep.subr.bf16.mxu1 %v4399_v58  ;;  %v393_v58 = vld [vmem:[#allocation2 + $0x848] sm:$0xff] }
  0xd3   :  { %v481_v39 = vld [vmem:[#allocation2 + $0xb08] sm:$0xff] }
  0xd4   :  { %2617 = vmatpush2.bf16.msra.mxu0 %v4652_v61  ;;  %v397_v61 = vld [vmem:[#allocation2 + $0x868] sm:$0xff] }
  0xd5   :  { %2660 = vmatpush2.bf16.msra.mxu1 %v4398_v62  ;;  %2618 = vmatprep.subr.bf16.mxu0 %v4645_v63  ;;  %v4590_v63 = vcombine.low %v401_v49, %v405_v51  ;;  %v4583_v4 = vcombine.high %v393_v58, %v397_v61  ;;  %v345_v44 = vld [vmem:[#allocation2 + $0x6c8] sm:$0xff] }
  0xd6   :  { %2661 = vmatprep.subr.bf16.mxu1 %v4391_v3  ;;  %v385_v3 = vld [vmem:[#allocation2 + $0x808] sm:$0xff] }
  0xd7   :  { %v473_v45 = vld [vmem:[#allocation2 + $0xac8] sm:$0xff] }
  0xd8   :  { %2619 = vmatpush2.bf16.msra.mxu0 %v4644_v5  ;;  %v389_v5 = vld [vmem:[#allocation2 + $0x828] sm:$0xff] }
  0xd9   :  { %2662 = vmatpush2.bf16.msra.mxu1 %v4390_v6  ;;  %2620 = vmatprep.subr.bf16.mxu0 %v4637_v7  ;;  %v4454_v6 = vcombine.low %v265_v55, %v269_v57  ;;  %v4582_v7 = vcombine.low %v393_v58, %v397_v61  ;;  %v4575_v10 = vcombine.high %v385_v3, %v389_v5  ;;  %v337_v49 = vld [vmem:[#allocation2 + $0x688] sm:$0xff] }
  0xda   :  { %2663 = vmatprep.subr.bf16.mxu1 %v4383_v11  ;;  %v381_v11 = vld [vmem:[#allocation2 + $0x7e8] sm:$0xff] }
  0xdb   :  { %v4567_v18 = vcombine.high %v377_v9, %v381_v11  ;;  %v465_v51 = vld [vmem:[#allocation2 + $0xa88] sm:$0xff] }
  0xdc   :  { %2621 = vmatpush2.bf16.msra.mxu0 %v4636_v14  ;;  %v509_v14 = vld [vmem:[#allocation2 + $0xbe8] sm:$0xff] }
  0xdd   :  { %2664 = vmatpush2.bf16.msra.mxu1 %v4382_v15  ;;  %2676 = vmatprep.subr.bf16.mxu0 %v4503_v17  ;;  %v4446_v15 = vcombine.low %v257_v1, %v261_v2  ;;  %v4574_v17 = vcombine.low %v385_v3, %v389_v5  ;;  %v4695_v19 = vcombine.high %v505_v13, %v509_v14  ;;  %v329_v58 = vld [vmem:[#allocation2 + $0x648] sm:$0xff] }
  0xde   :  { %2719 = vmatprep.subr.bf16.mxu1 %v4631_v21  ;;  %v373_v21 = vld [vmem:[#allocation2 + $0x7a8] sm:$0xff] }
  0xdf   :  { %2623 = vmatmul.mubr.bf16.vlgmr.msra.gmra.mxu0 %v5416_v16  ;;  %v4559_v27 = vcombine.high %v369_v20, %v373_v21  ;;  %v457_v61 = vld [vmem:[#allocation2 + $0xa48] sm:$0xff] }
  0xe0   :  { %2666 = vmatmul.mubr.bf16.vlgmr.msra.gmra.mxu1 %v5400_v12  ;;  %2677 = vmatpush1.bf16.msra.mxu0 %v4502_v24  ;;  %v4614_v12 = vcombine.low %v425_v30, %v429_v31  ;;  %v501_v24 = vld [vmem:[#allocation2 + $0xba8] sm:$0xff] }
  0xe1   :  { %2720 = vmatpush1.bf16.msra.mxu1 %v4630_v25  ;;  %2678 = vmatprep.subr.bf16.mxu0 %v4495_v26  ;;  %v4566_v25 = vcombine.low %v377_v9, %v381_v11  ;;  %v4694_v26 = vcombine.low %v505_v13, %v509_v14  ;;  %v4687_v28 = vcombine.high %v497_v23, %v501_v24  ;;  %v365_v30 = vld [vmem:[#allocation2 + $0x768] sm:$0xff]  ;;  %v186_v11 = vld [vmem:[#allocation2 + $0x1d0] sm:$0xff] }
  0xe2   :  { %2721 = vmatprep.subr.bf16.mxu1 %v4623_v29  ;;  %2708 = vmatprep.mubr.bf16.mxu0 %v5393_v59  ;;  %v4471_v59 = vcombine.high %v281_v42, %v285_v43  ;;  %v361_v29 = vld [vmem:[#allocation2 + $0x748] sm:$0xff]  ;;  %v190_v13 = vld [vmem:[#allocation2 + $0x1f0] sm:$0xff] }
  0xe3   :  { %2751 = vmatprep.mubr.bf16.mxu1 %v5408_v22  ;;  %v277_v22 = vld [vmem:[#allocation2 + $0x4a8] sm:$0xff]  ;;  %v4551_v35 = vcombine.high %v361_v29, %v365_v30  ;;  %v314_v14 = vld [vmem:[#allocation2 + $0x5d0] sm:$0xff] }
  0xe4   :  { %2679 = vmatpush1.bf16.msra.mxu0 %v4494_v32  ;;  %v4463_v54 = vcombine.high %v273_v48, %v277_v22  ;;  %v4462_v62 = vcombine.low %v273_v48, %v277_v22  ;;  %v489_v31 = vld [vmem:[#allocation2 + $0xb48] sm:$0xff] }
  0xe5   :  { %2722 = vmatpush1.bf16.msra.mxu1 %v4622_v33  ;;  %2680 = vmatprep.subr.bf16.mxu0 %v4487_v34  ;;  %v493_v32 = vld [vmem:[#allocation2 + $0xb68] sm:$0xff]  ;;  %v4558_v33 = vcombine.low %v369_v20, %v373_v21  ;;  %v4686_v34 = vcombine.low %v497_v23, %v501_v24  ;;  %v178_v21 = vld [vmem:[#allocation2 + $0x190] sm:$0xff] }
  0xe6   :  { %2723 = vmatprep.subr.bf16.mxu1 %v4615_v38  ;;  %v4679_v36 = vcombine.high %v489_v31, %v493_v32  ;;  %v357_v38 = vld [vmem:[#allocation2 + $0x728] sm:$0xff]  ;;  %v182_v23 = vld [vmem:[#allocation2 + $0x1b0] sm:$0xff] }
  0xe7   :  { %v4543_v42 = vcombine.high %v353_v37, %v357_v38  ;;  %v321_v3 = vld [vmem:[#allocation2 + $0x608] sm:$0xff]  ;;  %v306_v24 = vld [vmem:[#allocation2 + $0x590] sm:$0xff] }
  0xe8   :  { %2681 = vmatpush1.bf16.msra.mxu0 %v4486_v40  ;;  %v485_v40 = vld [vmem:[#allocation2 + $0xb28] sm:$0xff] }
  0xe9   :  { %2724 = vmatpush1.bf16.msra.mxu1 %v4614_v12  ;;  %2682 = vmatprep.subr.bf16.mxu0 %v4479_v41  ;;  %v4550_v12 = vcombine.low %v361_v29, %v365_v30  ;;  %v4678_v41 = vcombine.low %v489_v31, %v493_v32  ;;  %v4671_v43 = vcombine.high %v481_v39, %v485_v40  ;;  %v449_v5 = vld [vmem:[#allocation2 + $0xa08] sm:$0xff]  ;;  %v170_v30 = vld [vmem:[#allocation2 + $0x150] sm:$0xff] }
  0xea   :  { %2725 = vmatprep.subr.bf16.mxu1 %v4607_v56  ;;  %v349_v56 = vld [vmem:[#allocation2 + $0x6e8] sm:$0xff]  ;;  %v174_v31 = vld [vmem:[#allocation2 + $0x170] sm:$0xff] }
  0xeb   :  { %v4535_v48 = vcombine.high %v345_v44, %v349_v56  ;;  %v5425_v32 = vld [vmem:[%s5597_s0 + $0x8] ss:$24 sps:$4 sm:$0xff]  }
  0xec   :  { %2683 = vmatpush1.bf16.msra.mxu0 %v4478_v46  ;;  %v477_v46 = vld [vmem:[#allocation2 + $0xae8] sm:$0xff] }
  0xed   :  { %2726 = vmatpush1.bf16.msra.mxu1 %v4606_v47  ;;  %2684 = vmatprep.subr.bf16.mxu0 %v4471_v59  ;;  %v4542_v47 = vcombine.low %v353_v37, %v357_v38  ;;  %v4670_v59 = vcombine.low %v481_v39, %v485_v40  ;;  %v4663_v22 = vcombine.high %v473_v45, %v477_v46  ;;  %v162_v39 = vld [vmem:[#allocation2 + $0x110] sm:$0xff] }
  0xee   :  { %2727 = vmatprep.subr.bf16.mxu1 %v4599_v50  ;;  %v341_v50 = vld [vmem:[#allocation2 + $0x6a8] sm:$0xff]  ;;  %v4361_v37 = vcombine.high %v170_v30, %v174_v31  ;;  %v166_v40 = vld [vmem:[#allocation2 + $0x130] sm:$0xff] }
  0xef   :  { %v4527_v55 = vcombine.high %v337_v49, %v341_v50 }
  0xf0   :  { %2685 = vmatpush1.bf16.msra.mxu0 %v4470_v52  ;;  %v469_v52 = vld [vmem:[#allocation2 + $0xaa8] sm:$0xff] }
  0xf1   :  { %2728 = vmatpush1.bf16.msra.mxu1 %v4598_v53  ;;  %2686 = vmatprep.subr.bf16.mxu0 %v4463_v54  ;;  %v4534_v53 = vcombine.low %v345_v44, %v349_v56  ;;  %v4662_v54 = vcombine.low %v473_v45, %v477_v46  ;;  %v4655_v57 = vcombine.high %v465_v51, %v469_v52  ;;  %v154_v46 = vld [vmem:[#allocation2 + $0xd0] sm:$0xff] }
  0xf2   :  { %2729 = vmatprep.subr.bf16.mxu1 %v4591_v60  ;;  %v333_v60 = vld [vmem:[#allocation2 + $0x668] sm:$0xff]  ;;  %v4353_v56 = vcombine.high %v162_v39, %v166_v40 }
  0xf3   :  { %v4519_v1 = vcombine.high %v329_v58, %v333_v60 }
  0xf4   :  { %2687 = vmatpush1.bf16.msra.mxu0 %v4462_v62  ;;  %v461_v62 = vld [vmem:[#allocation2 + $0xa68] sm:$0xff] }
  0xf5   :  { %2730 = vmatpush1.bf16.msra.mxu1 %v4590_v63  ;;  %2688 = vmatprep.subr.bf16.mxu0 %v4455_v0  ;;  %v4526_v63 = vcombine.low %v337_v49, %v341_v50  ;;  %v4654_v0 = vcombine.low %v465_v51, %v469_v52  ;;  %v4647_v2 = vcombine.high %v457_v61, %v461_v62  ;;  %v146_v52 = vld [vmem:[#allocation2 + $0x90] sm:$0xff] }
  0xf6   :  { %2731 = vmatprep.subr.bf16.mxu1 %v4583_v4  ;;  %v325_v4 = vld [vmem:[#allocation2 + $0x628] sm:$0xff] }
  0xf7   :  { %v4511_v9 = vcombine.high %v321_v3, %v325_v4 }
  0xf8   :  { %2689 = vmatpush1.bf16.msra.mxu0 %v4454_v6  ;;  %v453_v6 = vld [vmem:[#allocation2 + $0xa28] sm:$0xff] }
  0xf9   :  { %2732 = vmatpush1.bf16.msra.mxu1 %v4582_v7  ;;  %2690 = vmatprep.subr.bf16.mxu0 %v4447_v8  ;;  %v4518_v7 = vcombine.low %v329_v58, %v333_v60  ;;  %v4646_v8 = vcombine.low %v457_v61, %v461_v62  ;;  %v138_v62 = vld [vmem:[#allocation2 + $0x50] sm:$0xff] }
  0xfa   :  { %2733 = vmatprep.subr.bf16.mxu1 %v4575_v10  ;;  %v4639_v10 = vcombine.high %v449_v5, %v453_v6 }
  0xfc   :  { %2691 = vmatpush1.bf16.msra.mxu0 %v4446_v15  ;;  %v318_v15 = vld [vmem:[#allocation2 + $0x5f0] sm:$0xff] }
  0xfd   :  { %2734 = vmatpush1.bf16.msra.mxu1 %v4574_v17  ;;  %2692 = vmatprep.subr.bf16.mxu0 %v4567_v18  ;;  %v4510_v17 = vcombine.low %v321_v3, %v325_v4  ;;  %v4638_v18 = vcombine.low %v449_v5, %v453_v6  ;;  %v4505_v20 = vcombine.high %v314_v14, %v318_v15  ;;  %v130_v6 = vld [vmem:[#allocation2 + $0x10] sm:$0xff] }
  0xfe   :  { %2735 = vmatprep.subr.bf16.mxu1 %v4695_v19  ;;  %v4377_v19 = vcombine.high %v186_v11, %v190_v13 }
 0x100   :  { %2693 = vmatpush2.bf16.msra.mxu0 %v4566_v25  ;;  %v310_v25 = vld [vmem:[#allocation2 + $0x5b0] sm:$0xff] }
 0x101   :  { %2736 = vmatpush2.bf16.msra.mxu1 %v4694_v26  ;;  %2694 = vmatprep.subr.bf16.mxu0 %v4559_v27  ;;  %v4376_v26 = vcombine.low %v186_v11, %v190_v13  ;;  %v4504_v27 = vcombine.low %v314_v14, %v318_v15  ;;  %v4497_v29 = vcombine.high %v306_v24, %v310_v25  ;;  %v250_v15 = vld [vmem:[#allocation2 + $0x3d0] sm:$0xff] }
 0x102   :  { %2737 = vmatprep.subr.bf16.mxu1 %v4687_v28  ;;  %v4369_v28 = vcombine.high %v178_v21, %v182_v23 }
 0x104   :  { %2695 = vmatpush2.bf16.msra.mxu0 %v4558_v33  ;;  %v298_v33 = vld [vmem:[#allocation2 + $0x550] sm:$0xff] }
 0x105   :  { %2738 = vmatpush2.bf16.msra.mxu1 %v4686_v34  ;;  %2696 = vmatprep.subr.bf16.mxu0 %v4551_v35  ;;  %v302_v34 = vld [vmem:[#allocation2 + $0x570] sm:$0xff]  ;;  %v4368_v35 = vcombine.low %v178_v21, %v182_v23 }
 0x106   :  { %2739 = vmatprep.subr.bf16.mxu1 %v4679_v36  ;;  %v4496_v36 = vcombine.low %v306_v24, %v310_v25  ;;  %v4489_v38 = vcombine.high %v298_v33, %v302_v34  ;;  %v4488_v44 = vcombine.low %v298_v33, %v302_v34  ;;  %v242_v25 = vld [vmem:[#allocation2 + $0x390] sm:$0xff] }
 0x107   :  { %v234_v34 = vld [vmem:[#allocation2 + $0x350] sm:$0xff] }
 0x108   :  { %2697 = vmatpush2.bf16.msra.mxu0 %v4550_v12  ;;  %v5432_v12 = vld [vmem:[%s5597_s0 + $0x4] ss:$24 sps:$4 sm:$0xff]  }
 0x109   :  { %2740 = vmatpush2.bf16.msra.mxu1 %v4678_v41  ;;  %2698 = vmatprep.subr.bf16.mxu0 %v4543_v42  ;;  %v290_v41 = vld [vmem:[#allocation2 + $0x510] sm:$0xff] }
 0x10a   :  { %2741 = vmatprep.subr.bf16.mxu1 %v4671_v43  ;;  %v294_v42 = vld [vmem:[#allocation2 + $0x530] sm:$0xff]  ;;  %v4360_v43 = vcombine.low %v170_v30, %v174_v31 }
 0x10b   :  { %v4481_v45 = vcombine.high %v290_v41, %v294_v42  ;;  %v4480_v49 = vcombine.low %v290_v41, %v294_v42  ;;  %v226_v42 = vld [vmem:[#allocation2 + $0x310] sm:$0xff] }
 0x10c   :  { %2699 = vmatpush2.bf16.msra.mxu0 %v4542_v47  ;;  %v158_v47 = vld [vmem:[#allocation2 + $0xf0] sm:$0xff] }
 0x10d   :  { %2742 = vmatpush2.bf16.msra.mxu1 %v4670_v59  ;;  %2700 = vmatprep.subr.bf16.mxu0 %v4535_v48  ;;  %v282_v59 = vld [vmem:[#allocation2 + $0x4d0] sm:$0xff]  ;;  %v4345_v50 = vcombine.high %v154_v46, %v158_v47 }
 0x10e   :  { %2743 = vmatprep.subr.bf16.mxu1 %v4663_v22  ;;  %v286_v48 = vld [vmem:[#allocation2 + $0x4f0] sm:$0xff]  ;;  %v4352_v22 = vcombine.low %v162_v39, %v166_v40 }
 0x10f   :  { %v4473_v51 = vcombine.high %v282_v59, %v286_v48  ;;  %v4472_v58 = vcombine.low %v282_v59, %v286_v48  ;;  %v218_v48 = vld [vmem:[#allocation2 + $0x2d0] sm:$0xff] }
 0x110   :  { %2701 = vmatpush2.bf16.msra.mxu0 %v4534_v53  ;;  %v150_v53 = vld [vmem:[#allocation2 + $0xb0] sm:$0xff] }
 0x111   :  { %2744 = vmatpush2.bf16.msra.mxu1 %v4662_v54  ;;  %2702 = vmatprep.subr.bf16.mxu0 %v4527_v55  ;;  %v274_v54 = vld [vmem:[#allocation2 + $0x490] sm:$0xff]  ;;  %v4337_v60 = vcombine.high %v146_v52, %v150_v53 }
 0x112   :  { %2745 = vmatprep.subr.bf16.mxu1 %v4655_v57  ;;  %v278_v55 = vld [vmem:[#allocation2 + $0x4b0] sm:$0xff]  ;;  %v4344_v57 = vcombine.low %v154_v46, %v158_v47 }
 0x113   :  { %v4465_v61 = vcombine.high %v274_v54, %v278_v55  ;;  %v4464_v3 = vcombine.low %v274_v54, %v278_v55  ;;  %v210_v55 = vld [vmem:[#allocation2 + $0x290] sm:$0xff] }
 0x114   :  { %2703 = vmatpush2.bf16.msra.mxu0 %v4526_v63  ;;  %v142_v63 = vld [vmem:[#allocation2 + $0x70] sm:$0xff] }
 0x115   :  { %2746 = vmatpush2.bf16.msra.mxu1 %v4654_v0  ;;  %2704 = vmatprep.subr.bf16.mxu0 %v4519_v1  ;;  %v266_v0 = vld [vmem:[#allocation2 + $0x450] sm:$0xff]  ;;  %v4329_v4 = vcombine.high %v138_v62, %v142_v63 }
 0x116   :  { %2747 = vmatprep.subr.bf16.mxu1 %v4647_v2  ;;  %v270_v1 = vld [vmem:[#allocation2 + $0x470] sm:$0xff]  ;;  %v4336_v2 = vcombine.low %v146_v52, %v150_v53 }
 0x117   :  { %v4457_v5 = vcombine.high %v266_v0, %v270_v1  ;;  %v4456_v11 = vcombine.low %v266_v0, %v270_v1  ;;  %v202_v1 = vld [vmem:[#allocation2 + $0x250] sm:$0xff] }
 0x118   :  { %2705 = vmatpush2.bf16.msra.mxu0 %v4518_v7  ;;  %v134_v7 = vld [vmem:[#allocation2 + $0x30] sm:$0xff] }
 0x119   :  { %2748 = vmatpush2.bf16.msra.mxu1 %v4646_v8  ;;  %2706 = vmatprep.subr.bf16.mxu0 %v4511_v9  ;;  %v258_v8 = vld [vmem:[#allocation2 + $0x410] sm:$0xff]  ;;  %v4321_v13 = vcombine.high %v130_v6, %v134_v7 }
 0x11a   :  { %2749 = vmatprep.subr.bf16.mxu1 %v4639_v10  ;;  %v262_v9 = vld [vmem:[#allocation2 + $0x430] sm:$0xff]  ;;  %v4328_v10 = vcombine.low %v138_v62, %v142_v63 }
 0x11b   :  { %v4449_v14 = vcombine.high %v258_v8, %v262_v9  ;;  %v4448_v21 = vcombine.low %v258_v8, %v262_v9 }
 0x11c   :  { %2707 = vmatpush2.bf16.msra.mxu0 %v4510_v17  ;;  %v254_v17 = vld [vmem:[#allocation2 + $0x3f0] sm:$0xff] }
 0x11d   :  { %2750 = vmatpush2.bf16.msra.mxu1 %v4638_v18  ;;  %2762 = vmatprep.subr.bf16.mxu0 %v4377_v19  ;;  %v378_v18 = vld [vmem:[#allocation2 + $0x7d0] sm:$0xff]  ;;  %v4441_v23 = vcombine.high %v250_v15, %v254_v17 }
 0x11e   :  { %2805 = vmatprep.subr.bf16.mxu1 %v4505_v20  ;;  %v382_v19 = vld [vmem:[#allocation2 + $0x7f0] sm:$0xff]  ;;  %v4320_v20 = vcombine.low %v130_v6, %v134_v7  ;;  %v514_v6 = vlaneseq }
 0x11f   :  { %2709 = vmatmul.mubr.bf16.vlgmr.msra.gmra.mxu0 %v5425_v32  ;;  %v4569_v24 = vcombine.high %v378_v18, %v382_v19  ;;  %v4568_v30 = vcombine.low %v378_v18, %v382_v19 }
 0x120   :  { %2752 = vmatmul.mubr.bf16.vlgmr.msra.gmra.mxu1 %v5416_v16  ;;  %2763 = vmatpush1.bf16.msra.mxu0 %v4376_v26  ;;  %v5438_v16 = vld [vmem:[%s5597_s0 + $0xc] ss:$24 sps:$4 sm:$0xff]   ;;  %v246_v26 = vld [vmem:[#allocation2 + $0x3b0] sm:$0xff] }
 0x121   :  { %2806 = vmatpush1.bf16.msra.mxu1 %v4504_v27  ;;  %2764 = vmatprep.subr.bf16.mxu0 %v4369_v28  ;;  %v370_v27 = vld [vmem:[#allocation2 + $0x790] sm:$0xff]  ;;  %v4433_v31 = vcombine.high %v242_v25, %v246_v26 }
 0x122   :  { %2807 = vmatprep.subr.bf16.mxu1 %v4497_v29  ;;  %2794 = vmatprep.mubr.bf16.mxu0 %v5432_v12  ;;  %v374_v28 = vld [vmem:[#allocation2 + $0x7b0] sm:$0xff]  ;;  %v4440_v29 = vcombine.low %v250_v15, %v254_v17  ;;  %v5441_v17 = vshrl.u32 %v514_v6, 7  ;;  %v155_v6 = vld [vmem:[#allocation2 + $0xd8] sm:$0xff] }
 0x123   :  { %2837 = vmatprep.mubr.bf16.mxu1 %v5438_v16  ;;  %v4561_v33 = vcombine.high %v370_v27, %v374_v28  ;;  %v4560_v39 = vcombine.low %v370_v27, %v374_v28 }
 0x124   :  { %2765 = vmatpush1.bf16.msra.mxu0 %v4368_v35  ;;  %v238_v35 = vld [vmem:[#allocation2 + $0x370] sm:$0xff]  ;;  %v516_v27 = vsub.s32 0, %v5441_v17 }
 0x125   :  { %2808 = vmatpush1.bf16.msra.mxu1 %v4496_v36  ;;  %2766 = vmatprep.subr.bf16.mxu0 %v4361_v37  ;;  %v362_v36 = vld [vmem:[#allocation2 + $0x750] sm:$0xff]  ;;  %v4425_v40 = vcombine.high %v234_v34, %v238_v35 }
 0x126   :  { %2809 = vmatprep.subr.bf16.mxu1 %v4489_v38  ;;  %v366_v37 = vld [vmem:[#allocation2 + $0x770] sm:$0xff]  ;;  %v4432_v38 = vcombine.low %v242_v25, %v246_v26  ;;  %v191_v25 = vld [vmem:[#allocation2 + $0x1f8] sm:$0xff] }
 0x127   :  { %v4553_v41 = vcombine.high %v362_v36, %v366_v37  ;;  %v4552_v46 = vcombine.low %v362_v36, %v366_v37  ;;  %v183_v36 = vld [vmem:[#allocation2 + $0x1b8] sm:$0xff] }
 0x128   :  { %2767 = vmatpush1.bf16.msra.mxu0 %v4360_v43  ;;  %v230_v43 = vld [vmem:[#allocation2 + $0x330] sm:$0xff] }
 0x129   :  { %2810 = vmatpush1.bf16.msra.mxu1 %v4488_v44  ;;  %2768 = vmatprep.subr.bf16.mxu0 %v4353_v56  ;;  %v354_v44 = vld [vmem:[#allocation2 + $0x710] sm:$0xff]  ;;  %v4417_v47 = vcombine.high %v226_v42, %v230_v43 }
 0x12a   :  { %2811 = vmatprep.subr.bf16.mxu1 %v4481_v45  ;;  %v358_v56 = vld [vmem:[#allocation2 + $0x730] sm:$0xff]  ;;  %v4424_v45 = vcombine.low %v234_v34, %v238_v35  ;;  %v179_v35 = vld [vmem:[#allocation2 + $0x198] sm:$0xff] }
 0x12b   :  { %v4545_v59 = vcombine.high %v354_v44, %v358_v56  ;;  %v4544_v52 = vcombine.low %v354_v44, %v358_v56  ;;  %v438_v34 = vld [vmem:[#allocation2 + $0x9b0] sm:$0xff]  ;;  %v5452_v56 = vld [vmem:[%s5597_s0] ss:$24 sps:$4 sm:$0xff]  }
 0x12c   :  { %2769 = vmatpush1.bf16.msra.mxu0 %v4352_v22  ;;  %v222_v22 = vld [vmem:[#allocation2 + $0x2f0] sm:$0xff] }
 0x12d   :  { %2812 = vmatpush1.bf16.msra.mxu1 %v4480_v49  ;;  %2770 = vmatprep.subr.bf16.mxu0 %v4345_v50  ;;  %v346_v49 = vld [vmem:[#allocation2 + $0x6d0] sm:$0xff]  ;;  %v4409_v53 = vcombine.high %v218_v48, %v222_v22 }
 0x12e   :  { %2813 = vmatprep.subr.bf16.mxu1 %v4473_v51  ;;  %v350_v50 = vld [vmem:[#allocation2 + $0x6f0] sm:$0xff]  ;;  %v4416_v51 = vcombine.low %v226_v42, %v230_v43 }
 0x12f   :  { %v4537_v54 = vcombine.high %v346_v49, %v350_v50  ;;  %v4536_v62 = vcombine.low %v346_v49, %v350_v50  ;;  %v426_v42 = vld [vmem:[#allocation2 + $0x950] sm:$0xff]  ;;  %v4370_v49 = vcombine.low %v179_v35, %v183_v36 }
 0x130   :  { %2771 = vmatpush1.bf16.msra.mxu0 %v4344_v57  ;;  %v214_v57 = vld [vmem:[#allocation2 + $0x2b0] sm:$0xff] }
 0x131   :  { %2814 = vmatpush1.bf16.msra.mxu1 %v4472_v58  ;;  %2772 = vmatprep.subr.bf16.mxu0 %v4337_v60  ;;  %v338_v58 = vld [vmem:[#allocation2 + $0x690] sm:$0xff]  ;;  %v4401_v63 = vcombine.high %v210_v55, %v214_v57 }
 0x132   :  { %2815 = vmatprep.subr.bf16.mxu1 %v4465_v61  ;;  %v342_v60 = vld [vmem:[#allocation2 + $0x6b0] sm:$0xff]  ;;  %v4408_v61 = vcombine.low %v218_v48, %v222_v22 }
 0x133   :  { %v4529_v0 = vcombine.high %v338_v58, %v342_v60  ;;  %v4528_v7 = vcombine.low %v338_v58, %v342_v60  ;;  %v430_v43 = vld [vmem:[#allocation2 + $0x970] sm:$0xff]  ;;  %v163_v58 = vld [vmem:[#allocation2 + $0x118] sm:$0xff] }
 0x134   :  { %2773 = vmatpush1.bf16.msra.mxu0 %v4336_v2  ;;  %v206_v2 = vld [vmem:[#allocation2 + $0x270] sm:$0xff]  ;;  %v4617_v50 = vcombine.high %v426_v42, %v430_v43  ;;  %v167_v60 = vld [vmem:[#allocation2 + $0x138] sm:$0xff] }
 0x135   :  { %2816 = vmatpush1.bf16.msra.mxu1 %v4464_v3  ;;  %2774 = vmatprep.subr.bf16.mxu0 %v4329_v4  ;;  %v330_v3 = vld [vmem:[#allocation2 + $0x650] sm:$0xff]  ;;  %v4393_v8 = vcombine.high %v202_v1, %v206_v2  ;;  %v4392_v15 = vcombine.low %v202_v1, %v206_v2 }
 0x136   :  { %2817 = vmatprep.subr.bf16.mxu1 %v4457_v5  ;;  %v334_v4 = vld [vmem:[#allocation2 + $0x670] sm:$0xff]  ;;  %v4400_v5 = vcombine.low %v210_v55, %v214_v57 }
 0x137   :  { %v4521_v9 = vcombine.high %v330_v3, %v334_v4  ;;  %v4520_v18 = vcombine.low %v330_v3, %v334_v4  ;;  %v422_v55 = vld [vmem:[#allocation2 + $0x930] sm:$0xff]  ;;  %v4355_v3 = vcombine.high %v163_v58, %v167_v60 }
 0x138   :  { %2775 = vmatpush1.bf16.msra.mxu0 %v4328_v10  ;;  %v194_v10 = vld [vmem:[#allocation2 + $0x210] sm:$0xff] }
 0x139   :  { %2818 = vmatpush1.bf16.msra.mxu1 %v4456_v11  ;;  %2776 = vmatprep.subr.bf16.mxu0 %v4321_v13  ;;  %v198_v11 = vld [vmem:[#allocation2 + $0x230] sm:$0xff] }
 0x13a   :  { %2819 = vmatprep.subr.bf16.mxu1 %v4449_v14  ;;  %v322_v13 = vld [vmem:[#allocation2 + $0x610] sm:$0xff]  ;;  %v4385_v19 = vcombine.high %v194_v10, %v198_v11  ;;  %v4384_v26 = vcombine.low %v194_v10, %v198_v11 }
 0x13b   :  { %v326_v14 = vld [vmem:[#allocation2 + $0x630] sm:$0xff] }
 0x13c   :  { %2777 = vmatpush1.bf16.msra.mxu0 %v4320_v20  ;;  %v4513_v20 = vcombine.high %v322_v13, %v326_v14  ;;  %v4512_v28 = vcombine.low %v322_v13, %v326_v14  ;;  %v410_v4 = vld [vmem:[#allocation2 + $0x8d0] sm:$0xff]  ;;  %v147_v14 = vld [vmem:[#allocation2 + $0x98] sm:$0xff] }
 0x13d   :  { %2820 = vmatpush1.bf16.msra.mxu1 %v4448_v21  ;;  %2778 = vmatprep.subr.bf16.mxu0 %v4441_v23  ;;  %v442_v21 = vld [vmem:[#allocation2 + $0x9d0] sm:$0xff] }
 0x13e   :  { %2821 = vmatprep.subr.bf16.mxu1 %v4569_v24  ;;  %v446_v23 = vld [vmem:[#allocation2 + $0x9f0] sm:$0xff]  ;;  %v187_v24 = vld [vmem:[#allocation2 + $0x1d8] sm:$0xff] }
 0x13f   :  { %v402_v11 = vld [vmem:[#allocation2 + $0x890] sm:$0xff] }
 0x140   :  { %2779 = vmatpush2.bf16.msra.mxu0 %v4440_v29  ;;  %v5444_v29 = vld [vmem:[#allocation4] sm:$0xff]  ;;  %v406_v13 = vld [vmem:[#allocation2 + $0x8b0] sm:$0xff] }
 0x141   :  { %2822 = vmatpush2.bf16.msra.mxu1 %v4568_v30  ;;  %2780 = vmatprep.subr.bf16.mxu0 %v4433_v31  ;;  %v4633_v30 = vcombine.high %v442_v21, %v446_v23  ;;  %v4379_v31 = vcombine.high %v187_v24, %v191_v25  ;;  %v517_v37 = vrot.slane %v5444_v29, %v516_v27 }
 0x142   :  { %2823 = vmatprep.subr.bf16.mxu1 %v4561_v33  ;;  %v434_v33 = vld [vmem:[#allocation2 + $0x990] sm:$0xff] }
 0x143   :  { %v4624_v48 = vcombine.low %v434_v33, %v438_v34 }
 0x144   :  { %2781 = vmatpush2.bf16.msra.mxu0 %v4432_v38  ;;  %v4632_v38 = vcombine.low %v442_v21, %v446_v23  ;;  %v394_v23 = vld [vmem:[#allocation2 + $0x850] sm:$0xff] }
 0x145   :  { %2824 = vmatpush2.bf16.msra.mxu1 %v4560_v39  ;;  %2782 = vmatprep.subr.bf16.mxu0 %v4425_v40  ;;  %v4378_v39 = vcombine.low %v187_v24, %v191_v25  ;;  %v4625_v40 = vcombine.high %v434_v33, %v438_v34  ;;  %v398_v24 = vld [vmem:[#allocation2 + $0x870] sm:$0xff]  ;;  %v139_v25 = vld [vmem:[#allocation2 + $0x58] sm:$0xff] }
 0x146   :  { %2825 = vmatprep.subr.bf16.mxu1 %v4553_v41  ;;  %v4371_v41 = vcombine.high %v179_v35, %v183_v36  ;;  %v386_v34 = vld [vmem:[#allocation2 + $0x810] sm:$0xff]  ;;  %v131_v36 = vld [vmem:[#allocation2 + $0x18] sm:$0xff] }
 0x147   :  { %v390_v35 = vld [vmem:[#allocation2 + $0x830] sm:$0xff] }
 0x148   :  { %2783 = vmatpush2.bf16.msra.mxu0 %v4424_v45  ;;  %v171_v45 = vld [vmem:[#allocation2 + $0x158] sm:$0xff] }
 0x149   :  { %2826 = vmatpush2.bf16.msra.mxu1 %v4552_v46  ;;  %2784 = vmatprep.subr.bf16.mxu0 %v4417_v47  ;;  %v175_v46 = vld [vmem:[#allocation2 + $0x178] sm:$0xff] }
 0x14a   :  { %2827 = vmatprep.subr.bf16.mxu1 %v4545_v59 }
 0x14c   :  { %2785 = vmatpush2.bf16.msra.mxu0 %v4416_v51 }
 0x14d   :  { %2828 = vmatpush2.bf16.msra.mxu1 %v4544_v52  ;;  %2786 = vmatprep.subr.bf16.mxu0 %v4409_v53  ;;  %v4363_v53 = vcombine.high %v171_v45, %v175_v46 }
 0x14e   :  { %2829 = vmatprep.subr.bf16.mxu1 %v4537_v54  ;;  %v418_v54 = vld [vmem:[#allocation2 + $0x910] sm:$0xff] }
 0x14f   :  { %v4609_v1 = vcombine.high %v418_v54, %v422_v55 }
 0x150   :  { %2787 = vmatpush2.bf16.msra.mxu0 %v4408_v61 }
 0x151   :  { %2830 = vmatpush2.bf16.msra.mxu1 %v4536_v62  ;;  %2788 = vmatprep.subr.bf16.mxu0 %v4401_v63  ;;  %v4616_v62 = vcombine.low %v426_v42, %v430_v43  ;;  %v506_v42 = vld [vmem:[#allocation2 + $0xbd0] sm:$0xff] }
 0x152   :  { %2831 = vmatprep.subr.bf16.mxu1 %v4529_v0  ;;  %v4362_v0 = vcombine.low %v171_v45, %v175_v46  ;;  %v510_v43 = vld [vmem:[#allocation2 + $0xbf0] sm:$0xff]  ;;  %v255_v45 = vld [vmem:[#allocation2 + $0x3f8] sm:$0xff]  ;;  %v4576_v46 = vcombine.low %v386_v34, %v390_v35 }
 0x154   :  { %2789 = vmatpush2.bf16.msra.mxu0 %v4400_v5  ;;  %v414_v5 = vld [vmem:[#allocation2 + $0x8f0] sm:$0xff] }
 0x155   :  { %2832 = vmatpush2.bf16.msra.mxu1 %v4528_v7  ;;  %2790 = vmatprep.subr.bf16.mxu0 %v4393_v8  ;;  %v159_v7 = vld [vmem:[#allocation2 + $0xf8] sm:$0xff]  ;;  %v4608_v8 = vcombine.low %v418_v54, %v422_v55  ;;  %v4696_v55 = vcombine.low %v506_v42, %v510_v43 }
 0x156   :  { %2833 = vmatprep.subr.bf16.mxu1 %v4521_v9  ;;  %v4601_v9 = vcombine.high %v410_v4, %v414_v5  ;;  %v4347_v10 = vcombine.high %v155_v6, %v159_v7  ;;  %v247_v54 = vld [vmem:[#allocation2 + $0x3b8] sm:$0xff] }
 0x158   :  { %2791 = vmatpush2.bf16.msra.mxu0 %v4392_v15  ;;  %v151_v15 = vld [vmem:[#allocation2 + $0xb8] sm:$0xff] }
 0x159   :  { %2834 = vmatpush2.bf16.msra.mxu1 %v4520_v18  ;;  %2792 = vmatprep.subr.bf16.mxu0 %v4385_v19  ;;  %v4600_v18 = vcombine.low %v410_v4, %v414_v5  ;;  %v4346_v19 = vcombine.low %v155_v6, %v159_v7  ;;  %v4339_v21 = vcombine.high %v147_v14, %v151_v15  ;;  %v482_v6 = vld [vmem:[#allocation2 + $0xb10] sm:$0xff] }
 0x15a   :  { %2835 = vmatprep.subr.bf16.mxu1 %v4513_v20  ;;  %v4593_v20 = vcombine.high %v402_v11, %v406_v13  ;;  %v486_v7 = vld [vmem:[#allocation2 + $0xb30] sm:$0xff] }
 0x15c   :  { %2793 = vmatpush2.bf16.msra.mxu0 %v4384_v26  ;;  %v143_v26 = vld [vmem:[#allocation2 + $0x78] sm:$0xff] }
 0x15d   :  { %2836 = vmatpush2.bf16.msra.mxu1 %v4512_v28  ;;  %2848 = vmatprep.subr.bf16.mxu0 %v4633_v30  ;;  %v4592_v28 = vcombine.low %v402_v11, %v406_v13  ;;  %v4338_v30 = vcombine.low %v147_v14, %v151_v15  ;;  %v4331_v33 = vcombine.high %v139_v25, %v143_v26  ;;  %v474_v14 = vld [vmem:[#allocation2 + $0xad0] sm:$0xff] }
 0x15e   :  { %2891 = vmatprep.subr.bf16.mxu1 %v4379_v31  ;;  %v4585_v31 = vcombine.high %v394_v23, %v398_v24  ;;  %v4673_v11 = vcombine.high %v482_v6, %v486_v7  ;;  %v478_v15 = vld [vmem:[#allocation2 + $0xaf0] sm:$0xff] }
 0x15f   :  { %v2538_v44 = vpop.f32.mrf.mxu0  ;;  %2795 = vmatmul.mubr.bf16.vlgmr.msra.gmra.mxu0 %v5452_v56 }
 0x160   :  { %v2539_v47 = vadd.f32 %v2538_v44, %v517_v37  ;;  %v2581_v59 = vpop.f32.mrf.mxu1  ;;  %2838 = vmatmul.mubr.bf16.vlgmr.msra.gmra.mxu1 %v5425_v32  ;;  %2849 = vmatpush1.bf16.msra.mxu0 %v4632_v38  ;;  %v5465_v32 = vld [vmem:[%s5597_s0 + $0x14] ss:$24 sps:$4 sm:$0xff]   ;;  %v4584_v38 = vcombine.low %v394_v23, %v398_v24  ;;  %v251_v44 = vld [vmem:[#allocation2 + $0x3d8] sm:$0xff]  ;;  %v4665_v23 = vcombine.high %v474_v14, %v478_v15 }
 0x161   :  { %2892 = vmatpush1.bf16.msra.mxu1 %v4378_v39  ;;  %v5456_v22 = vpop.f32.mrf.mxu0  ;;  %2850 = vmatprep.subr.bf16.mxu0 %v4625_v40  ;;  %v4330_v39 = vcombine.low %v139_v25, %v143_v26  ;;  %v4577_v40 = vcombine.high %v386_v34, %v390_v35  ;;  %v466_v25 = vld [vmem:[#allocation2 + $0xa90] sm:$0xff] }
 0x162   :  { %v5458_v51 = vadd.f32 %v2581_v59, %v2539_v47  ;;  %v5460_v52 = vpop.f32.mrf.mxu1  ;;  %2893 = vmatprep.subr.bf16.mxu1 %v4371_v41  ;;  %2880 = vmatprep.mubr.bf16.mxu0 %v5465_v32  ;;  %v4697_v59 = vcombine.high %v506_v42, %v510_v43  ;;  %v470_v26 = vld [vmem:[#allocation2 + $0xab0] sm:$0xff] }
 0x163   :  { %v2542_v57 = vpop.f32.mrf.mxu0  ;;  %2923 = vmatprep.mubr.bf16.mxu1 %v5432_v12  ;;  %v4354_v12 = vcombine.low %v163_v58, %v167_v60  ;;  %v4657_v34 = vcombine.high %v466_v25, %v470_v26 }
 0x164   :  { %v2543_v61 = vadd.f32 %v2542_v57, %v517_v37  ;;  %2851 = vmatpush1.bf16.msra.mxu0 %v4624_v48  ;;  %v2585_v63 = vpop.f32.mrf.mxu1  ;;  %v135_v37 = vld [vmem:[#allocation2 + $0x38] sm:$0xff]  ;;  %v4443_v48 = vcombine.high %v251_v44, %v255_v45  ;;  %v4442_v57 = vcombine.low %v251_v44, %v255_v45  ;;  %v450_v44 = vld [vmem:[#allocation2 + $0xa10] sm:$0xff] }
 0x165   :  { %2894 = vmatpush1.bf16.msra.mxu1 %v4370_v49  ;;  %2852 = vmatprep.subr.bf16.mxu0 %v4617_v50  ;;  %v4323_v41 = vcombine.high %v131_v36, %v135_v37  ;;  %v4322_v47 = vcombine.low %v131_v36, %v135_v37  ;;  %v498_v49 = vld [vmem:[#allocation2 + $0xb90] sm:$0xff] }
 0x166   :  { %v5469_v2 = vadd.f32 %v2585_v63, %v2543_v61  ;;  %2895 = vmatprep.subr.bf16.mxu1 %v4363_v53  ;;  %v502_v50 = vld [vmem:[#allocation2 + $0xbb0] sm:$0xff]  ;;  %v243_v53 = vld [vmem:[#allocation2 + $0x398] sm:$0xff] }
 0x167   :  { %v4689_v58 = vcombine.high %v498_v49, %v502_v50  ;;  %v4435_v60 = vcombine.high %v243_v53, %v247_v54  ;;  %v490_v61 = vld [vmem:[#allocation2 + $0xb50] sm:$0xff]  ;;  %v235_v63 = vld [vmem:[#allocation2 + $0x358] sm:$0xff] }
 0x168   :  { %2853 = vmatpush1.bf16.msra.mxu0 %v4616_v62  ;;  %v494_v62 = vld [vmem:[#allocation2 + $0xb70] sm:$0xff] }
 0x169   :  { %2896 = vmatpush1.bf16.msra.mxu1 %v4362_v0  ;;  %2854 = vmatprep.subr.bf16.mxu0 %v4609_v1  ;;  %v239_v0 = vld [vmem:[#allocation2 + $0x378] sm:$0xff]  ;;  %v4688_v1 = vcombine.low %v498_v49, %v502_v50  ;;  %v4681_v4 = vcombine.high %v490_v61, %v494_v62  ;;  %v458_v36 = vld [vmem:[#allocation2 + $0xa50] sm:$0xff] }
 0x16a   :  { %2897 = vmatprep.subr.bf16.mxu1 %v4355_v3  ;;  %v4434_v3 = vcombine.low %v243_v53, %v247_v54  ;;  %v4427_v5 = vcombine.high %v235_v63, %v239_v0  ;;  %v462_v37 = vld [vmem:[#allocation2 + $0xa70] sm:$0xff]  ;;  %v315_v53 = vld [vmem:[#allocation2 + $0x5d8] sm:$0xff] }
 0x16b   :  { %v4649_v42 = vcombine.high %v458_v36, %v462_v37  ;;  %v454_v45 = vld [vmem:[#allocation2 + $0xa30] sm:$0xff]  ;;  %v319_v54 = vld [vmem:[#allocation2 + $0x5f8] sm:$0xff] }
 0x16c   :  { %2855 = vmatpush1.bf16.msra.mxu0 %v4608_v8  ;;  %v227_v8 = vld [vmem:[#allocation2 + $0x318] sm:$0xff]  ;;  %v4641_v49 = vcombine.high %v450_v44, %v454_v45 }
 0x16d   :  { %2898 = vmatpush1.bf16.msra.mxu1 %v4354_v12  ;;  %2856 = vmatprep.subr.bf16.mxu0 %v4601_v9  ;;  %v231_v12 = vld [vmem:[#allocation2 + $0x338] sm:$0xff]  ;;  %v4680_v9 = vcombine.low %v490_v61, %v494_v62  ;;  %v4507_v61 = vcombine.high %v315_v53, %v319_v54 }
 0x16e   :  { %2899 = vmatprep.subr.bf16.mxu1 %v4347_v10  ;;  %v4426_v10 = vcombine.low %v235_v63, %v239_v0  ;;  %v4419_v13 = vcombine.high %v227_v8, %v231_v12  ;;  %v307_v63 = vld [vmem:[#allocation2 + $0x598] sm:$0xff] }
 0x16f   :  { %v311_v0 = vld [vmem:[#allocation2 + $0x5b8] sm:$0xff] }
 0x170   :  { %2857 = vmatpush1.bf16.msra.mxu0 %v4600_v18  ;;  %v219_v18 = vld [vmem:[#allocation2 + $0x2d8] sm:$0xff] }
 0x171   :  { %2900 = vmatpush1.bf16.msra.mxu1 %v4346_v19  ;;  %2858 = vmatprep.subr.bf16.mxu0 %v4593_v20  ;;  %v223_v19 = vld [vmem:[#allocation2 + $0x2f8] sm:$0xff]  ;;  %v4672_v20 = vcombine.low %v482_v6, %v486_v7  ;;  %v4499_v7 = vcombine.high %v307_v63, %v311_v0 }
 0x172   :  { %2901 = vmatprep.subr.bf16.mxu1 %v4339_v21  ;;  %v4418_v21 = vcombine.low %v227_v8, %v231_v12  ;;  %v4411_v24 = vcombine.high %v219_v18, %v223_v19  ;;  %v299_v12 = vld [vmem:[#allocation2 + $0x558] sm:$0xff] }
 0x174   :  { %2859 = vmatpush1.bf16.msra.mxu0 %v4592_v28  ;;  %v211_v28 = vld [vmem:[#allocation2 + $0x298] sm:$0xff] }
 0x175   :  { %2902 = vmatpush1.bf16.msra.mxu1 %v4338_v30  ;;  %2860 = vmatprep.subr.bf16.mxu0 %v4585_v31  ;;  %v215_v30 = vld [vmem:[#allocation2 + $0x2b8] sm:$0xff]  ;;  %v4664_v31 = vcombine.low %v474_v14, %v478_v15 }
 0x176   :  { %2903 = vmatprep.subr.bf16.mxu1 %v4331_v33  ;;  %v4410_v33 = vcombine.low %v219_v18, %v223_v19  ;;  %v4403_v35 = vcombine.high %v211_v28, %v215_v30  ;;  %v431_v14 = vld [vmem:[#allocation2 + $0x978] sm:$0xff]  ;;  %v4498_v18 = vcombine.low %v307_v63, %v311_v0 }
 0x177   :  { %v263_v63 = vld [vmem:[#allocation2 + $0x438] sm:$0xff] }
 0x178   :  { %2861 = vmatpush1.bf16.msra.mxu0 %v4584_v38  ;;  %v203_v38 = vld [vmem:[#allocation2 + $0x258] sm:$0xff] }
 0x179   :  { %2904 = vmatpush1.bf16.msra.mxu1 %v4330_v39  ;;  %2862 = vmatprep.subr.bf16.mxu0 %v4577_v40  ;;  %v207_v39 = vld [vmem:[#allocation2 + $0x278] sm:$0xff]  ;;  %v4656_v40 = vcombine.low %v466_v25, %v470_v26 }
 0x17a   :  { %2905 = vmatprep.subr.bf16.mxu1 %v4323_v41  ;;  %v4402_v41 = vcombine.low %v211_v28, %v215_v30  ;;  %v4395_v43 = vcombine.high %v203_v38, %v207_v39  ;;  %v295_v25 = vld [vmem:[#allocation2 + $0x538] sm:$0xff] }
 0x17b   :  { %v419_v28 = vld [vmem:[#allocation2 + $0x918] sm:$0xff] }
 0x17c   :  { %2863 = vmatpush1.bf16.msra.mxu0 %v4576_v46  ;;  %v195_v46 = vld [vmem:[#allocation2 + $0x218] sm:$0xff] }
 0x17d   :  { %2906 = vmatpush1.bf16.msra.mxu1 %v4322_v47  ;;  %2864 = vmatprep.subr.bf16.mxu0 %v4697_v59  ;;  %v199_v47 = vld [vmem:[#allocation2 + $0x238] sm:$0xff]  ;;  %v4648_v59 = vcombine.low %v458_v36, %v462_v37 }
 0x17e   :  { %2907 = vmatprep.subr.bf16.mxu1 %v4443_v48  ;;  %v4394_v48 = vcombine.low %v203_v38, %v207_v39  ;;  %v4387_v50 = vcombine.high %v195_v46, %v199_v47  ;;  %v423_v30 = vld [vmem:[#allocation2 + $0x938] sm:$0xff] }
 0x17f   :  { %v4611_v36 = vcombine.high %v419_v28, %v423_v30  ;;  %v283_v37 = vld [vmem:[#allocation2 + $0x4d8] sm:$0xff] }
 0x180   :  { %2865 = vmatpush2.bf16.msra.mxu0 %v4696_v55  ;;  %v443_v55 = vld [vmem:[#allocation2 + $0x9d8] sm:$0xff] }
 0x181   :  { %2908 = vmatpush2.bf16.msra.mxu1 %v4442_v57  ;;  %2866 = vmatprep.subr.bf16.mxu0 %v4689_v58  ;;  %v447_v57 = vld [vmem:[#allocation2 + $0x9f8] sm:$0xff]  ;;  %v4640_v58 = vcombine.low %v450_v44, %v454_v45 }
 0x182   :  { %2909 = vmatprep.subr.bf16.mxu1 %v4435_v60  ;;  %v4386_v60 = vcombine.low %v195_v46, %v199_v47  ;;  %v4635_v62 = vcombine.high %v443_v55, %v447_v57  ;;  %v4634_v6 = vcombine.low %v443_v55, %v447_v57  ;;  %v287_v38 = vld [vmem:[#allocation2 + $0x4f8] sm:$0xff] }
 0x183   :  { %v415_v39 = vld [vmem:[#allocation2 + $0x8f8] sm:$0xff]  ;;  %v4474_v47 = vcombine.low %v283_v37, %v287_v38 }
 0x184   :  { %2867 = vmatpush2.bf16.msra.mxu0 %v4688_v1  ;;  %v435_v1 = vld [vmem:[#allocation2 + $0x998] sm:$0xff] }
 0x185   :  { %2910 = vmatpush2.bf16.msra.mxu1 %v4434_v3  ;;  %2868 = vmatprep.subr.bf16.mxu0 %v4681_v4  ;;  %v439_v3 = vld [vmem:[#allocation2 + $0x9b8] sm:$0xff]  ;;  %v4506_v4 = vcombine.low %v315_v53, %v319_v54 }
 0x186   :  { %2911 = vmatprep.subr.bf16.mxu1 %v4427_v5  ;;  %v5471_v5 = vpop.f32.mrf.mxu0  ;;  %v4627_v8 = vcombine.high %v435_v1, %v439_v3  ;;  %v279_v44 = vld [vmem:[#allocation2 + $0x4b8] sm:$0xff] }
 0x187   :  { %v403_v45 = vld [vmem:[#allocation2 + $0x898] sm:$0xff] }
 0x188   :  { %2869 = vmatpush2.bf16.msra.mxu0 %v4680_v9  ;;  %v303_v9 = vld [vmem:[#allocation2 + $0x578] sm:$0xff] }
 0x189   :  { %2912 = vmatpush2.bf16.msra.mxu1 %v4426_v10  ;;  %2870 = vmatprep.subr.bf16.mxu0 %v4673_v11  ;;  %v5476_v11 = vld [vmem:[%s5597_s0 + $0x10] ss:$24 sps:$4 sm:$0xff]   ;;  %v407_v46 = vld [vmem:[#allocation2 + $0x8b8] sm:$0xff] }
 0x18a   :  { %2913 = vmatprep.subr.bf16.mxu1 %v4419_v13  ;;  %v427_v13 = vld [vmem:[#allocation2 + $0x958] sm:$0xff] }
 0x18b   :  { %v271_v53 = vld [vmem:[#allocation2 + $0x478] sm:$0xff] }
 0x18c   :  { %2871 = vmatpush2.bf16.msra.mxu0 %v4672_v20  ;;  %v4626_v20 = vcombine.low %v435_v1, %v439_v3  ;;  %v395_v54 = vld [vmem:[#allocation2 + $0x858] sm:$0xff] }
 0x18d   :  { %2914 = vmatpush2.bf16.msra.mxu1 %v4418_v21  ;;  %2872 = vmatprep.subr.bf16.mxu0 %v4665_v23  ;;  %v4491_v21 = vcombine.high %v299_v12, %v303_v9  ;;  %v4619_v23 = vcombine.high %v427_v13, %v431_v14  ;;  %v399_v55 = vld [vmem:[#allocation2 + $0x878] sm:$0xff] }
 0x18e   :  { %2915 = vmatprep.subr.bf16.mxu1 %v4411_v24  ;;  %v291_v24 = vld [vmem:[#allocation2 + $0x518] sm:$0xff] }
 0x18f   :  { %v387_v0 = vld [vmem:[#allocation2 + $0x818] sm:$0xff] }
 0x190   :  { %2873 = vmatpush2.bf16.msra.mxu0 %v4664_v31  ;;  %v4618_v31 = vcombine.low %v427_v13, %v431_v14  ;;  %v391_v1 = vld [vmem:[#allocation2 + $0x838] sm:$0xff] }
 0x191   :  { %2916 = vmatpush2.bf16.msra.mxu1 %v4410_v33  ;;  %2874 = vmatprep.subr.bf16.mxu0 %v4657_v34  ;;  %v4483_v33 = vcombine.high %v291_v24, %v295_v25  ;;  %v4578_v14 = vcombine.low %v387_v0, %v391_v1 }
 0x192   :  { %2917 = vmatprep.subr.bf16.mxu1 %v4403_v35 }
 0x194   :  { %2875 = vmatpush2.bf16.msra.mxu0 %v4656_v40 }
 0x195   :  { %2918 = vmatpush2.bf16.msra.mxu1 %v4402_v41  ;;  %2876 = vmatprep.subr.bf16.mxu0 %v4649_v42  ;;  %v4475_v41 = vcombine.high %v283_v37, %v287_v38  ;;  %v355_v38 = vld [vmem:[#allocation2 + $0x718] sm:$0xff] }
 0x196   :  { %2919 = vmatprep.subr.bf16.mxu1 %v4395_v43  ;;  %v275_v43 = vld [vmem:[#allocation2 + $0x498] sm:$0xff] }
 0x197   :  { %v4466_v57 = vcombine.low %v275_v43, %v279_v44 }
 0x198   :  { %2877 = vmatpush2.bf16.msra.mxu0 %v4648_v59 }
 0x199   :  { %2920 = vmatpush2.bf16.msra.mxu1 %v4394_v48  ;;  %2878 = vmatprep.subr.bf16.mxu0 %v4641_v49  ;;  %v4467_v48 = vcombine.high %v275_v43, %v279_v44  ;;  %v4595_v49 = vcombine.high %v403_v45, %v407_v46  ;;  %v347_v44 = vld [vmem:[#allocation2 + $0x6d8] sm:$0xff] }
 0x19a   :  { %2921 = vmatprep.subr.bf16.mxu1 %v4387_v50  ;;  %v267_v50 = vld [vmem:[#allocation2 + $0x458] sm:$0xff] }
 0x19b   :  { %v4458_v3 = vcombine.low %v267_v50, %v271_v53 }
 0x19c   :  { %2879 = vmatpush2.bf16.msra.mxu0 %v4640_v58  ;;  %v4594_v58 = vcombine.low %v403_v45, %v407_v46  ;;  %v351_v45 = vld [vmem:[#allocation2 + $0x6f8] sm:$0xff] }
 0x19d   :  { %2922 = vmatpush2.bf16.msra.mxu1 %v4386_v60  ;;  %2934 = vmatprep.subr.bf16.mxu0 %v4507_v61  ;;  %v4459_v60 = vcombine.high %v267_v50, %v271_v53  ;;  %v4587_v61 = vcombine.high %v395_v54, %v399_v55  ;;  %v475_v46 = vld [vmem:[#allocation2 + $0xad8] sm:$0xff] }
 0x19e   :  { %2977 = vmatprep.subr.bf16.mxu1 %v4635_v62  ;;  %v259_v62 = vld [vmem:[#allocation2 + $0x418] sm:$0xff] }
 0x19f   :  { %v2624_v10 = vpop.f32.mrf.mxu0  ;;  %2881 = vmatmul.mubr.bf16.vlgmr.msra.gmra.mxu0 %v5476_v11  ;;  %v4450_v13 = vcombine.low %v259_v62, %v263_v63  ;;  %v339_v53 = vld [vmem:[#allocation2 + $0x698] sm:$0xff] }
 0x1a0   :  { %v2625_v15 = vadd.f32 %v2624_v10, %v5458_v51  ;;  %2924 = vmatmul.mubr.bf16.vlgmr.msra.gmra.mxu1 %v5452_v56  ;;  %2935 = vmatpush1.bf16.msra.mxu0 %v4506_v4  ;;  %v4490_v51 = vcombine.low %v299_v12, %v303_v9  ;;  %v4586_v4 = vcombine.low %v395_v54, %v399_v55  ;;  %v383_v12 = vld [vmem:[#allocation2 + $0x7f8] sm:$0xff]  ;;  %v520_v55 = vsub.s32 1, %v5441_v17 }
 0x1a1   :  { %2978 = vmatpush1.bf16.msra.mxu1 %v4634_v6  ;;  %v5481_v19 = vpop.f32.mrf.mxu0  ;;  %2936 = vmatprep.subr.bf16.mxu0 %v4499_v7  ;;  %v4451_v6 = vcombine.high %v259_v62, %v263_v63  ;;  %v4579_v7 = vcombine.high %v387_v0, %v391_v1  ;;  %v507_v9 = vld [vmem:[#allocation2 + $0xbd8] sm:$0xff] }
 0x1a2   :  { %2979 = vmatprep.subr.bf16.mxu1 %v4627_v8  ;;  %2966 = vmatprep.mubr.bf16.mxu0 %v5438_v16  ;;  %v3020_v34 = vmax.f32 %v2625_v15, 0.0  ;;  %v411_v16 = vld [vmem:[#allocation2 + $0x8d8] sm:$0xff] }
 0x1a3   :  { %v2628_v26 = vpop.f32.mrf.mxu0  ;;  %3009 = vmatprep.mubr.bf16.mxu1 %v5465_v32  ;;  %v4482_v32 = vcombine.low %v291_v24, %v295_v25  ;;  %v4603_v42 = vcombine.high %v411_v16, %v415_v39  ;;  %v4602_v59 = vcombine.low %v411_v16, %v415_v39  ;;  %v379_v8 = vld [vmem:[#allocation2 + $0x7d8] sm:$0xff] }
 0x1a4   :  { %v2629_v56 = vadd.f32 %v2628_v26, %v5469_v2  ;;  %2937 = vmatpush1.bf16.msra.mxu0 %v4498_v18  ;;  %v4610_v2 = vcombine.low %v419_v28, %v423_v30  ;;  %v511_v10 = vld [vmem:[#allocation2 + $0xbf8] sm:$0xff]  ;;  %v4571_v15 = vcombine.high %v379_v8, %v383_v12  ;;  %v4570_v25 = vcombine.low %v379_v8, %v383_v12 }
 0x1a5   :  { %2980 = vmatpush1.bf16.msra.mxu1 %v4626_v20  ;;  %2938 = vmatprep.subr.bf16.mxu0 %v4491_v21  ;;  %v4699_v18 = vcombine.high %v507_v9, %v511_v10  ;;  %v371_v20 = vld [vmem:[#allocation2 + $0x798] sm:$0xff]  ;;  %v4698_v26 = vcombine.low %v507_v9, %v511_v10 }
 0x1a6   :  { %v3028_v35 = vmax.f32 %v2629_v56, 0.0  ;;  %2981 = vmatprep.subr.bf16.mxu1 %v4619_v23  ;;  %v375_v21 = vld [vmem:[#allocation2 + $0x7b8] sm:$0xff] }
 0x1a7   :  { %v499_v23 = vld [vmem:[#allocation2 + $0xb98] sm:$0xff]  ;;  %v4563_v28 = vcombine.high %v371_v20, %v375_v21 }
 0x1a8   :  { %v5486_v40 = vpack.c.bf16 %v3028_v35, %v3020_v34  ;;  %2939 = vmatpush1.bf16.msra.mxu0 %v4490_v51  ;;  %v503_v24 = vld [vmem:[#allocation2 + $0xbb8] sm:$0xff]  ;;  %v4562_v34 = vcombine.low %v371_v20, %v375_v21 }
 0x1a9   :  { %2982 = vmatpush1.bf16.msra.mxu1 %v4618_v31  ;;  %2940 = vmatprep.subr.bf16.mxu0 %v4483_v33  ;;  %v4691_v30 = vcombine.high %v499_v23, %v503_v24  ;;  %v363_v56 = vld [vmem:[#allocation2 + $0x758] sm:$0xff]  ;;  %v4690_v35 = vcombine.low %v499_v23, %v503_v24  ;;  %v2630_v24 = vpop.f32.mrf.mxu0 }
 0x1aa   :  { %2983 = vmatprep.subr.bf16.mxu1 %v4611_v36  ;;  %v367_v51 = vld [vmem:[#allocation2 + $0x778] sm:$0xff] }
 0x1ab   :  { %v491_v31 = vld [vmem:[#allocation2 + $0xb58] sm:$0xff]  ;;  %v4555_v36 = vcombine.high %v363_v56, %v367_v51 }
 0x1ac   :  { %2941 = vmatpush1.bf16.msra.mxu0 %v4482_v32  ;;  %v495_v33 = vld [vmem:[#allocation2 + $0xb78] sm:$0xff] }
 0x1ad   :  { %2984 = vmatpush1.bf16.msra.mxu1 %v4610_v2  ;;  %2942 = vmatprep.subr.bf16.mxu0 %v4475_v41  ;;  %v4683_v37 = vcombine.high %v491_v31, %v495_v33  ;;  %v359_v16 = vld [vmem:[#allocation2 + $0x738] sm:$0xff]  ;;  %v4554_v2 = vcombine.low %v363_v56, %v367_v51  ;;  %v4682_v41 = vcombine.low %v491_v31, %v495_v33  ;;  %v528_v33 = vsub.s32 3, %v5441_v17 }
 0x1ae   :  { %2985 = vmatprep.subr.bf16.mxu1 %v4603_v42  ;;  %v483_v39 = vld [vmem:[#allocation2 + $0xb18] sm:$0xff]  ;;  %v4547_v42 = vcombine.high %v355_v38, %v359_v16 }
 0x1af   :  { %v487_v32 = vld [vmem:[#allocation2 + $0xb38] sm:$0xff] }
 0x1b0   :  { %2943 = vmatpush1.bf16.msra.mxu0 %v4474_v47  ;;  %v4675_v43 = vcombine.high %v483_v39, %v487_v32  ;;  %v479_v47 = vld [vmem:[#allocation2 + $0xaf8] sm:$0xff] }
 0x1b1   :  { %2986 = vmatpush1.bf16.msra.mxu1 %v4602_v59  ;;  %2944 = vmatprep.subr.bf16.mxu0 %v4467_v48  ;;  %v4546_v59 = vcombine.low %v355_v38, %v359_v16  ;;  %v4674_v48 = vcombine.low %v483_v39, %v487_v32  ;;  %v4667_v50 = vcombine.high %v475_v46, %v479_v47  ;;  %v343_v54 = vld [vmem:[#allocation2 + $0x6b8] sm:$0xff] }
 0x1b2   :  { %2987 = vmatprep.subr.bf16.mxu1 %v4595_v49  ;;  %v4539_v49 = vcombine.high %v347_v44, %v351_v45  ;;  %v4531_v62 = vcombine.high %v339_v53, %v343_v54  ;;  %v331_v0 = vld [vmem:[#allocation2 + $0x658] sm:$0xff]  ;;  %v4530_v8 = vcombine.low %v339_v53, %v343_v54  ;;  %v529_v39 = vrot.slane %v5444_v29, %v528_v33  ;;  %v4963_v33 = vld [vmem:[#allocation6 + $0x100] ss:$8 sps:$4 sm:$0xff]  }
 0x1b3   :  { %v335_v1 = vld [vmem:[#allocation2 + $0x678] sm:$0xff] }
 0x1b4   :  { %2945 = vmatpush1.bf16.msra.mxu0 %v4466_v57  ;;  %v467_v57 = vld [vmem:[#allocation2 + $0xa98] sm:$0xff]  ;;  %v4523_v10 = vcombine.high %v331_v0, %v335_v1 }
 0x1b5   :  { %2988 = vmatpush1.bf16.msra.mxu1 %v4594_v58  ;;  %2946 = vmatprep.subr.bf16.mxu0 %v4459_v60  ;;  %v471_v58 = vld [vmem:[#allocation2 + $0xab8] sm:$0xff]  ;;  %v4538_v60 = vcombine.low %v347_v44, %v351_v45  ;;  %v5144_v45 = vld [vmem:[%s5597_s0 + $0x8] ss:$24 sps:$4 sm:$0xff]  }
 0x1b6   :  { %2989 = vmatprep.subr.bf16.mxu1 %v4587_v61  ;;  %v4666_v61 = vcombine.low %v475_v46, %v479_v47  ;;  %v4659_v63 = vcombine.high %v467_v57, %v471_v58  ;;  %v4658_v9 = vcombine.low %v467_v57, %v471_v58  ;;  %v451_v21 = vld [vmem:[#allocation2 + $0xa18] sm:$0xff]  ;;  %v4924_v47 = vld [vmem:[#allocation6 + $0x60] ss:$8 sps:$4 sm:$0xff]  }
 0x1b7   :  { %v455_v23 = vld [vmem:[#allocation2 + $0xa38] sm:$0xff] }
 0x1b8   :  { %2947 = vmatpush1.bf16.msra.mxu0 %v4458_v3  ;;  %v521_v3 = vrot.slane %v5444_v29, %v520_v55  ;;  %v4643_v56 = vcombine.high %v451_v21, %v455_v23  ;;  %v4923_v38 = vld [vmem:[#allocation6 + $0x174] ss:$8 sps:$4 sm:$0xff]  }
 0x1b9   :  { %2990 = vmatpush1.bf16.msra.mxu1 %v4586_v4  ;;  %2948 = vmatprep.subr.bf16.mxu0 %v4451_v6  ;;  %v459_v4 = vld [vmem:[#allocation2 + $0xa58] sm:$0xff] }
 0x1ba   :  { %2991 = vmatprep.subr.bf16.mxu1 %v4579_v7  ;;  %v463_v6 = vld [vmem:[#allocation2 + $0xa78] sm:$0xff]  ;;  %v2587_v7 = vpop.f32.mrf.mxu1  ;;  %v2545_v12 = vadd.f32 %v5471_v5, %v521_v3  ;;  %v2541_v20 = vadd.f32 %v5456_v22, %v521_v3  ;;  %v4941_v3 = vld [vmem:[#allocation6 + $0x144] ss:$8 sps:$4 sm:$0xff]  }
 0x1bb   :  { %v4650_v5 = vcombine.low %v459_v4, %v463_v6  ;;  %v4935_v54 = vld [vmem:[#allocation6 + $0x154] ss:$8 sps:$4 sm:$0xff]  }
 0x1bc   :  { %2949 = vmatpush1.bf16.msra.mxu0 %v4450_v13  ;;  %v5493_v13 = vpop.f32.mrf.mxu1  ;;  %v2584_v51 = vadd.f32 %v5460_v52, %v2541_v20  ;;  %v4918_v52 = vld [vmem:[#allocation6 + $0x70] ss:$8 sps:$4 sm:$0xff]  }
 0x1bd   :  { %2992 = vmatpush1.bf16.msra.mxu1 %v4578_v14  ;;  %2950 = vmatprep.subr.bf16.mxu0 %v4571_v15  ;;  %v4651_v14 = vcombine.high %v459_v4, %v463_v6  ;;  %v323_v15 = vld [vmem:[#allocation2 + $0x618] sm:$0xff] }
 0x1be   :  { %2993 = vmatprep.subr.bf16.mxu1 %v4699_v18  ;;  %v327_v18 = vld [vmem:[#allocation2 + $0x638] sm:$0xff] }
 0x1bf   :  { %v4514_v22 = vcombine.low %v323_v15, %v327_v18  ;;  %v4945_v20 = vld [vmem:[#allocation6 + $0x130] ss:$8 sps:$4 sm:$0xff]  }
 0x1c0   :  { %2951 = vmatpush2.bf16.msra.mxu0 %v4570_v25  ;;  %v4522_v25 = vcombine.low %v331_v0, %v335_v1 }
 0x1c1   :  { %2994 = vmatpush2.bf16.msra.mxu1 %v4698_v26  ;;  %2952 = vmatprep.subr.bf16.mxu0 %v4563_v28  ;;  %v2588_v26 = vadd.f32 %v2587_v7, %v2545_v12  ;;  %v4515_v28 = vcombine.high %v323_v15, %v327_v18  ;;  %v4936_v7 = vld [vmem:[#allocation6 + $0x40] ss:$8 sps:$4 sm:$0xff]   ;;  %v4944_v12 = vld [vmem:[#allocation6 + $0x34] ss:$8 sps:$4 sm:$0xff]   ;;  %v4942_v18 = vld [vmem:[#allocation6 + $0x30] ss:$8 sps:$4 sm:$0xff]  }
 0x1c2   :  { %2995 = vmatprep.subr.bf16.mxu1 %v4691_v30  ;;  %v2669_v30 = vpop.f32.mrf.mxu1 }
 0x1c3   :  { %v2631_v31 = vadd.f32 %v2630_v24, %v2588_v26  ;;  %v2670_v46 = vadd.f32 %v2669_v30, %v529_v39  ;;  %v4948_v24 = vld [vmem:[#allocation6 + $0x20] ss:$8 sps:$4 sm:$0xff]   ;;  %v4956_v26 = vld [vmem:[#allocation6 + $0x14] ss:$8 sps:$4 sm:$0xff]   ;;  %v4957_v30 = vld [vmem:[#allocation6 + $0x110] ss:$8 sps:$4 sm:$0xff]  }
 0x1c4   :  { %2953 = vmatpush2.bf16.msra.mxu0 %v4562_v34  ;;  %v2627_v34 = vadd.f32 %v5481_v19, %v2584_v51  ;;  %v4926_v19 = vld [vmem:[#allocation6 + $0x64] ss:$8 sps:$4 sm:$0xff]  }
 0x1c5   :  { %2996 = vmatpush2.bf16.msra.mxu1 %v4690_v35  ;;  %2954 = vmatprep.subr.bf16.mxu0 %v4555_v36  ;;  %v4642_v35 = vcombine.low %v451_v21, %v455_v23  ;;  %v4920_v36 = vld [vmem:[#allocation6 + $0x74] ss:$8 sps:$4 sm:$0xff]   ;;  %v3029_v16 = vmax.f32 %v2631_v31, 0.0  ;;  %v4950_v21 = vld [vmem:[#allocation6 + $0x24] ss:$8 sps:$4 sm:$0xff]  }
 0x1c6   :  { %2997 = vmatprep.subr.bf16.mxu1 %v4683_v37  ;;  %v5499_v37 = vpop.f32.mrf.mxu1  ;;  %v3021_v32 = vmax.f32 %v2627_v34, 0.0  ;;  %v4953_v23 = vld [vmem:[#allocation6 + $0x124] ss:$8 sps:$4 sm:$0xff]   ;;  %v4960_v31 = vld [vmem:[#allocation6] ss:$8 sps:$4 sm:$0xff]  }
 0x1c7   :  { %v4965_v51 = vld [vmem:[#allocation6 + $0x104] ss:$8 sps:$4 sm:$0xff]   ;;  %v4971_v34 = vld [vmem:[#allocation6 + $0x1f4] ss:$8 sps:$4 sm:$0xff]  }
 0x1c8   :  { %2955 = vmatpush2.bf16.msra.mxu0 %v4554_v2  ;;  %v4921_v2 = vld [vmem:[#allocation6 + $0x170] ss:$8 sps:$4 sm:$0xff]  }
 0x1c9   :  { %2998 = vmatpush2.bf16.msra.mxu1 %v4682_v41  ;;  %2956 = vmatprep.subr.bf16.mxu0 %v4547_v42  ;;  %v2673_v41 = vpop.f32.mrf.mxu1  ;;  %v4929_v42 = vld [vmem:[#allocation6 + $0x164] ss:$8 sps:$4 sm:$0xff]  }
 0x1ca   :  { %2999 = vmatprep.subr.bf16.mxu1 %v4675_v43  ;;  %v3037_v43 = vpack.c.bf16 %v3029_v16, %v3021_v32  ;;  %v2674_v58 = vadd.f32 %v2673_v41, %v529_v39  ;;  %v4977_v16 = vld [vmem:[#allocation6 + $0x1e4] ss:$8 sps:$4 sm:$0xff]   ;;  %v4972_v39 = vld [vmem:[#allocation6 + $0xe0] ss:$8 sps:$4 sm:$0xff]   ;;  %v4980_v32 = vld [vmem:[#allocation6 + $0xd4] ss:$8 sps:$4 sm:$0xff]  }
 0x1cb   :  { %v4978_v41 = vld [vmem:[#allocation6 + $0xd0] ss:$8 sps:$4 sm:$0xff]  }
 0x1cc   :  { %2957 = vmatpush2.bf16.msra.mxu0 %v4546_v59 }
 0x1cd   :  { %3000 = vmatpush2.bf16.msra.mxu1 %v4674_v48  ;;  %2958 = vmatprep.subr.bf16.mxu0 %v4539_v49  ;;  %v4927_v48 = vld [vmem:[#allocation6 + $0x160] ss:$8 sps:$4 sm:$0xff]   ;;  %v4932_v49 = vld [vmem:[#allocation6 + $0x54] ss:$8 sps:$4 sm:$0xff]  }
 0x1ce   :  { %3001 = vmatprep.subr.bf16.mxu1 %v4667_v50 }
 0x1d0   :  { %2959 = vmatpush2.bf16.msra.mxu0 %v4538_v60 }
 0x1d1   :  { %3002 = vmatpush2.bf16.msra.mxu1 %v4666_v61  ;;  %2960 = vmatprep.subr.bf16.mxu0 %v4531_v62  ;;  %v4930_v61 = vld [vmem:[#allocation6 + $0x50] ss:$8 sps:$4 sm:$0xff]  }
 0x1d2   :  { %3003 = vmatprep.subr.bf16.mxu1 %v4659_v63  ;;  %v4933_v62 = vld [vmem:[#allocation6 + $0x150] ss:$8 sps:$4 sm:$0xff]   ;;  %v4938_v63 = vld [vmem:[#allocation6 + $0x44] ss:$8 sps:$4 sm:$0xff]  }
 0x1d4   :  { %2961 = vmatpush2.bf16.msra.mxu0 %v4530_v8  ;;  %v4939_v8 = vld [vmem:[#allocation6 + $0x140] ss:$8 sps:$4 sm:$0xff]  }
 0x1d5   :  { %3004 = vmatpush2.bf16.msra.mxu1 %v4658_v9  ;;  %2962 = vmatprep.subr.bf16.mxu0 %v4523_v10 }
 0x1d6   :  { %3005 = vmatprep.subr.bf16.mxu1 %v4651_v14  ;;  %v4947_v14 = vld [vmem:[#allocation6 + $0x134] ss:$8 sps:$4 sm:$0xff]  }
 0x1d8   :  { %2963 = vmatpush2.bf16.msra.mxu0 %v4522_v25  ;;  %v4951_v25 = vld [vmem:[#allocation6 + $0x120] ss:$8 sps:$4 sm:$0xff]  }
 0x1d9   :  { %3006 = vmatpush2.bf16.msra.mxu1 %v4650_v5  ;;  %2964 = vmatprep.subr.bf16.mxu0 %v4515_v28  ;;  %v4959_v5 = vld [vmem:[#allocation6 + $0x114] ss:$8 sps:$4 sm:$0xff]   ;;  %v4954_v28 = vld [vmem:[#allocation6 + $0x10] ss:$8 sps:$4 sm:$0xff]  }
 0x1da   :  { %3007 = vmatprep.subr.bf16.mxu1 %v4643_v56  ;;  %v4962_v56 = vld [vmem:[#allocation6 + $0x4] ss:$8 sps:$4 sm:$0xff]  }
 0x1dc   :  { %2965 = vmatpush2.bf16.msra.mxu0 %v4514_v22  ;;  %v4968_v22 = vld [vmem:[#allocation6 + $0xf4] ss:$8 sps:$4 sm:$0xff]  }
 0x1dd   :  { %3008 = vmatpush2.bf16.msra.mxu1 %v4642_v35  ;;  %3824 = vmatprep.subr.bf16.mxu0 %v4920_v36  ;;  %v4966_v35 = vld [vmem:[#allocation6 + $0xf0] ss:$8 sps:$4 sm:$0xff]  }
 0x1de   :  { %3867 = vmatprep.subr.bf16.mxu1 %v4923_v38  ;;  %v4969_v36 = vld [vmem:[#allocation6 + $0x1f0] ss:$8 sps:$4 sm:$0xff]   ;;  %v4974_v38 = vld [vmem:[#allocation6 + $0xe4] ss:$8 sps:$4 sm:$0xff]  }
 0x1df   :  { %v5502_v44 = vpop.f32.mrf.mxu0  ;;  %2967 = vmatmul.mubr.bf16.vlgmr.msra.gmra.mxu0 %v5144_v45  ;;  %v524_v45 = vsub.s32 2, %v5441_v17 }
 0x1e0   :  { %v5507_v29 = vpop.f32.mrf.mxu1  ;;  %3010 = vmatmul.mubr.bf16.vlgmr.msra.gmra.mxu1 %v5476_v11  ;;  %3825 = vmatpush1.bf16.msra.mxu0 %v4918_v52  ;;  %v4975_v52 = vld [vmem:[#allocation6 + $0x1e0] ss:$8 sps:$4 sm:$0xff]  }
 0x1e1   :  { %3856 = vmatprep.mubr.bf16.mxu0 %v3037_v43  ;;  %3868 = vmatpush1.bf16.msra.mxu1 %v4921_v2  ;;  %v2712_v59 = vpop.f32.mrf.mxu0  ;;  %v4983_v2 = vld [vmem:[#allocation6 + $0x1d4] ss:$8 sps:$4 sm:$0xff]   ;;  %v4989_v43 = vld [vmem:[#allocation6 + $0x1c4] ss:$8 sps:$4 sm:$0xff]  }
 0x1e2   :  { %v2713_v50 = vadd.f32 %v2712_v59, %v2670_v46  ;;  %v2755_v53 = vpop.f32.mrf.mxu1  ;;  %3826 = vmatprep.subr.bf16.mxu0 %v4926_v19  ;;  %3869 = vmatprep.subr.bf16.mxu1 %v4929_v42  ;;  %v4981_v19 = vld [vmem:[#allocation6 + $0x1d0] ss:$8 sps:$4 sm:$0xff]   ;;  %v4986_v42 = vld [vmem:[#allocation6 + $0xc4] ss:$8 sps:$4 sm:$0xff]   ;;  %v4984_v46 = vld [vmem:[#allocation6 + $0xc0] ss:$8 sps:$4 sm:$0xff]  }
 0x1e3   :  { %v5510_v57 = vpop.f32.mrf.mxu0  ;;  %v4992_v59 = vld [vmem:[#allocation6 + $0xb4] ss:$8 sps:$4 sm:$0xff]  }
 0x1e4   :  { %v5512_v60 = vpop.f32.mrf.mxu1  ;;  %3827 = vmatpush1.bf16.msra.mxu0 %v4924_v47  ;;  %v2756_v0 = vadd.f32 %v2755_v53, %v2713_v50  ;;  %v4987_v47 = vld [vmem:[#allocation6 + $0x1c0] ss:$8 sps:$4 sm:$0xff]   ;;  %v4990_v53 = vld [vmem:[#allocation6 + $0xb0] ss:$8 sps:$4 sm:$0xff]  }
 0x1e5   :  { %3870 = vmatpush1.bf16.msra.mxu1 %v4927_v48  ;;  %v2716_v11 = vpop.f32.mrf.mxu0  ;;  %3828 = vmatprep.subr.bf16.mxu0 %v4932_v49  ;;  %v4995_v48 = vld [vmem:[#allocation6 + $0x1b4] ss:$8 sps:$4 sm:$0xff]  }
 0x1e6   :  { %v2717_v1 = vadd.f32 %v2716_v11, %v2674_v58  ;;  %3871 = vmatprep.subr.bf16.mxu1 %v4935_v54  ;;  %v2759_v4 = vpop.f32.mrf.mxu1  ;;  %v3023_v9 = vmax.f32 %v2756_v0, 0.0  ;;  %v5515_v49 = vld [vmem:[#allocation4] sm:$0xff]  ;;  %v4998_v58 = vld [vmem:[#allocation6 + $0xa4] ss:$8 sps:$4 sm:$0xff]  }
 0x1e7   :  { %v525_v50 = vrot.slane %v5515_v49, %v524_v45  ;;  %v4993_v54 = vld [vmem:[#allocation6 + $0x1b0] ss:$8 sps:$4 sm:$0xff]   ;;  %v5004_v0 = vld [vmem:[#allocation6 + $0x94] ss:$8 sps:$4 sm:$0xff]  }
 0x1e8   :  { %v2760_v6 = vadd.f32 %v2759_v4, %v2717_v1  ;;  %3829 = vmatpush1.bf16.msra.mxu0 %v4930_v61  ;;  %v5001_v61 = vld [vmem:[#allocation6 + $0x1a4] ss:$8 sps:$4 sm:$0xff]   ;;  %v5007_v4 = vld [vmem:[#allocation6 + $0x194] ss:$8 sps:$4 sm:$0xff]  }
 0x1e9   :  { %3872 = vmatpush1.bf16.msra.mxu1 %v4933_v62  ;;  %3830 = vmatprep.subr.bf16.mxu0 %v4938_v63  ;;  %v2672_v11 = vadd.f32 %v5499_v37, %v525_v50  ;;  %v4996_v62 = vld [vmem:[#allocation6 + $0xa0] ss:$8 sps:$4 sm:$0xff]   ;;  %v2668_v1 = vadd.f32 %v5493_v13, %v525_v50  ;;  %v5010_v37 = vld [vmem:[#allocation6 + $0x84] ss:$8 sps:$4 sm:$0xff]   ;;  %v5040_v45 = vld [vmem:[#allocation6 + $0x2f4] ss:$8 sps:$4 sm:$0xff]  }
 0x1ea   :  { %v3031_v10 = vmax.f32 %v2760_v6, 0.0  ;;  %3873 = vmatprep.subr.bf16.mxu1 %v4941_v3  ;;  %v4999_v63 = vld [vmem:[#allocation6 + $0x1a0] ss:$8 sps:$4 sm:$0xff]   ;;  %v5086_v50 = vld [vmem:[#allocation6 + $0x3f0] ss:$8 sps:$4 sm:$0xff]  }
 0x1eb   :  { %v2715_v3 = vadd.f32 %v5510_v57, %v2672_v11  ;;  %v2711_v6 = vadd.f32 %v5502_v44, %v2668_v1  ;;  %v5008_v13 = vld [vmem:[#allocation6 + $0x80] ss:$8 sps:$4 sm:$0xff]   ;;  %v5064_v44 = vld [vmem:[#allocation6 + $0x374] ss:$8 sps:$4 sm:$0xff]   ;;  %v5097_v1 = vld [vmem:[#allocation6 + $0x3c4] ss:$8 sps:$4 sm:$0xff]  }
 0x1ec   :  { %v3039_v15 = vpack.c.bf16 %v3031_v10, %v3023_v9  ;;  %3831 = vmatpush1.bf16.msra.mxu0 %v4936_v7  ;;  %v5002_v7 = vld [vmem:[#allocation6 + $0x90] ss:$8 sps:$4 sm:$0xff]   ;;  %v5013_v9 = vld [vmem:[#allocation6 + $0x184] ss:$8 sps:$4 sm:$0xff]   ;;  %v5011_v57 = vld [vmem:[#allocation6 + $0x180] ss:$8 sps:$4 sm:$0xff]  }
 0x1ed   :  { %3874 = vmatpush1.bf16.msra.mxu1 %v4939_v8  ;;  %3832 = vmatprep.subr.bf16.mxu0 %v4944_v12  ;;  %v5005_v8 = vld [vmem:[#allocation6 + $0x190] ss:$8 sps:$4 sm:$0xff]   ;;  %v2758_v12 = vadd.f32 %v5512_v60, %v2715_v3  ;;  %v2754_v10 = vadd.f32 %v5507_v29, %v2711_v6  ;;  %v5017_v29 = vld [vmem:[#allocation6 + $0x260] ss:$8 sps:$4 sm:$0xff]   ;;  %v5094_v11 = vld [vmem:[#allocation6 + $0x3d4] ss:$8 sps:$4 sm:$0xff]  }
 0x1ee   :  { %3899 = vmatprep.mubr.bf16.mxu1 %v3039_v15  ;;  %3875 = vmatprep.subr.bf16.mxu1 %v4947_v14  ;;  %v5016_v14 = vld [vmem:[#allocation6 + $0x274] ss:$8 sps:$4 sm:$0xff]   ;;  %v5062_v60 = vld [vmem:[#allocation6 + $0x370] ss:$8 sps:$4 sm:$0xff]   ;;  %v5047_v3 = vld [vmem:[#allocation6 + $0x2c0] ss:$8 sps:$4 sm:$0xff]  }
 0x1ef   :  { %v3030_v15 = vmax.f32 %v2758_v12, 0.0  ;;  %v5095_v6 = vld [vmem:[#allocation6 + $0x3c0] ss:$8 sps:$4 sm:$0xff]   ;;  %v5098_v12 = vld [vmem:[#allocation6 + $0x3b0] ss:$8 sps:$4 sm:$0xff]  }
 0x1f0   :  { %3833 = vmatpush1.bf16.msra.mxu0 %v4942_v18  ;;  %v3022_v18 = vmax.f32 %v2754_v10, 0.0  ;;  %v5053_v10 = vld [vmem:[#allocation6 + $0x2a0] ss:$8 sps:$4 sm:$0xff]  }
 0x1f1   :  { %3876 = vmatpush1.bf16.msra.mxu1 %v4945_v20  ;;  %3834 = vmatprep.subr.bf16.mxu0 %v4950_v21  ;;  %v5014_v20 = vld [vmem:[#allocation6 + $0x270] ss:$8 sps:$4 sm:$0xff]   ;;  %v5019_v21 = vld [vmem:[#allocation6 + $0x264] ss:$8 sps:$4 sm:$0xff]  }
 0x1f2   :  { %3877 = vmatprep.subr.bf16.mxu1 %v4953_v23  ;;  %v3038_v23 = vpack.c.bf16 %v3030_v15, %v3022_v18  ;;  %v5106_v15 = vld [vmem:[#allocation6 + $0x394] ss:$8 sps:$4 sm:$0xff]  }
 0x1f4   :  { %3835 = vmatpush1.bf16.msra.mxu0 %v4948_v24  ;;  %v5067_v24 = vld [vmem:[#allocation6 + $0x364] ss:$8 sps:$4 sm:$0xff]  }
 0x1f5   :  { %3878 = vmatpush1.bf16.msra.mxu1 %v4951_v25  ;;  %3836 = vmatprep.subr.bf16.mxu0 %v4956_v26  ;;  %v5022_v25 = vld [vmem:[#allocation6 + $0x254] ss:$8 sps:$4 sm:$0xff]   ;;  %v5065_v26 = vld [vmem:[#allocation6 + $0x360] ss:$8 sps:$4 sm:$0xff]  }
 0x1f6   :  { %3879 = vmatprep.subr.bf16.mxu1 %v4959_v5  ;;  %v5070_v5 = vld [vmem:[#allocation6 + $0x354] ss:$8 sps:$4 sm:$0xff]  }
 0x1f8   :  { %3837 = vmatpush1.bf16.msra.mxu0 %v4954_v28  ;;  %v5020_v28 = vld [vmem:[#allocation6 + $0x250] ss:$8 sps:$4 sm:$0xff]  }
 0x1f9   :  { %3880 = vmatpush1.bf16.msra.mxu1 %v4957_v30  ;;  %3838 = vmatprep.subr.bf16.mxu0 %v4962_v56  ;;  %v5025_v30 = vld [vmem:[#allocation6 + $0x244] ss:$8 sps:$4 sm:$0xff]   ;;  %v5068_v56 = vld [vmem:[#allocation6 + $0x350] ss:$8 sps:$4 sm:$0xff]  }
 0x1fa   :  { %3881 = vmatprep.subr.bf16.mxu1 %v4965_v51  ;;  %v5073_v51 = vld [vmem:[#allocation6 + $0x344] ss:$8 sps:$4 sm:$0xff]  }
 0x1fc   :  { %3839 = vmatpush1.bf16.msra.mxu0 %v4960_v31  ;;  %v5023_v31 = vld [vmem:[#allocation6 + $0x240] ss:$8 sps:$4 sm:$0xff]  }
 0x1fd   :  { %3882 = vmatpush1.bf16.msra.mxu1 %v4963_v33  ;;  %3840 = vmatprep.subr.bf16.mxu0 %v4968_v22  ;;  %v5071_v33 = vld [vmem:[#allocation6 + $0x340] ss:$8 sps:$4 sm:$0xff]   ;;  %v5076_v22 = vld [vmem:[#allocation6 + $0x334] ss:$8 sps:$4 sm:$0xff]  }
 0x1fe   :  { %3883 = vmatprep.subr.bf16.mxu1 %v4971_v34  ;;  %v5026_v34 = vld [vmem:[#allocation6 + $0x230] ss:$8 sps:$4 sm:$0xff]  }
 0x200   :  { %3841 = vmatpush2.bf16.msra.mxu0 %v4966_v35  ;;  %v5031_v35 = vld [vmem:[#allocation6 + $0x224] ss:$8 sps:$4 sm:$0xff]  }
 0x201   :  { %3884 = vmatpush2.bf16.msra.mxu1 %v4969_v36  ;;  %3842 = vmatprep.subr.bf16.mxu0 %v4974_v38  ;;  %v5074_v36 = vld [vmem:[#allocation6 + $0x330] ss:$8 sps:$4 sm:$0xff]   ;;  %v5079_v38 = vld [vmem:[#allocation6 + $0x324] ss:$8 sps:$4 sm:$0xff]  }
 0x202   :  { %3885 = vmatprep.subr.bf16.mxu1 %v4977_v16  ;;  %v5029_v16 = vld [vmem:[#allocation6 + $0x220] ss:$8 sps:$4 sm:$0xff]  }
 0x204   :  { %3843 = vmatpush2.bf16.msra.mxu0 %v4972_v39  ;;  %v5034_v39 = vld [vmem:[#allocation6 + $0x214] ss:$8 sps:$4 sm:$0xff]  }
 0x205   :  { %3886 = vmatpush2.bf16.msra.mxu1 %v4975_v52  ;;  %3844 = vmatprep.subr.bf16.mxu0 %v4980_v32  ;;  %v5077_v52 = vld [vmem:[#allocation6 + $0x320] ss:$8 sps:$4 sm:$0xff]   ;;  %v5082_v32 = vld [vmem:[#allocation6 + $0x314] ss:$8 sps:$4 sm:$0xff]  }
 0x206   :  { %3887 = vmatprep.subr.bf16.mxu1 %v4983_v2  ;;  %v5032_v2 = vld [vmem:[#allocation6 + $0x210] ss:$8 sps:$4 sm:$0xff]  }
 0x208   :  { %3845 = vmatpush2.bf16.msra.mxu0 %v4978_v41  ;;  %v5037_v41 = vld [vmem:[#allocation6 + $0x204] ss:$8 sps:$4 sm:$0xff]  }
 0x209   :  { %3888 = vmatpush2.bf16.msra.mxu1 %v4981_v19  ;;  %3846 = vmatprep.subr.bf16.mxu0 %v4986_v42  ;;  %v5080_v19 = vld [vmem:[#allocation6 + $0x310] ss:$8 sps:$4 sm:$0xff]   ;;  %v5085_v42 = vld [vmem:[#allocation6 + $0x304] ss:$8 sps:$4 sm:$0xff]  }
 0x20a   :  { %3889 = vmatprep.subr.bf16.mxu1 %v4989_v43  ;;  %v5035_v43 = vld [vmem:[#allocation6 + $0x200] ss:$8 sps:$4 sm:$0xff]  }
 0x20c   :  { %3847 = vmatpush2.bf16.msra.mxu0 %v4984_v46  ;;  %v5083_v46 = vld [vmem:[#allocation6 + $0x300] ss:$8 sps:$4 sm:$0xff]  }
 0x20d   :  { %3890 = vmatpush2.bf16.msra.mxu1 %v4987_v47  ;;  %3848 = vmatprep.subr.bf16.mxu0 %v4992_v59  ;;  %v5088_v47 = vld [vmem:[#allocation6 + $0x3f4] ss:$8 sps:$4 sm:$0xff]   ;;  %v5038_v59 = vld [vmem:[#allocation6 + $0x2f0] ss:$8 sps:$4 sm:$0xff]  }
 0x20e   :  { %3891 = vmatprep.subr.bf16.mxu1 %v4995_v48  ;;  %v5043_v48 = vld [vmem:[#allocation6 + $0x2e4] ss:$8 sps:$4 sm:$0xff]  }
 0x210   :  { %3849 = vmatpush2.bf16.msra.mxu0 %v4990_v53  ;;  %v5091_v53 = vld [vmem:[#allocation6 + $0x3e4] ss:$8 sps:$4 sm:$0xff]  }
 0x211   :  { %3892 = vmatpush2.bf16.msra.mxu1 %v4993_v54  ;;  %3850 = vmatprep.subr.bf16.mxu0 %v4998_v58  ;;  %v5041_v54 = vld [vmem:[#allocation6 + $0x2e0] ss:$8 sps:$4 sm:$0xff]   ;;  %v5046_v58 = vld [vmem:[#allocation6 + $0x2d4] ss:$8 sps:$4 sm:$0xff]  }
 0x212   :  { %3893 = vmatprep.subr.bf16.mxu1 %v5001_v61  ;;  %v5089_v61 = vld [vmem:[#allocation6 + $0x3e0] ss:$8 sps:$4 sm:$0xff]  }
 0x214   :  { %3851 = vmatpush2.bf16.msra.mxu0 %v4996_v62  ;;  %v5044_v62 = vld [vmem:[#allocation6 + $0x2d0] ss:$8 sps:$4 sm:$0xff]  }
 0x215   :  { %3894 = vmatpush2.bf16.msra.mxu1 %v4999_v63  ;;  %3852 = vmatprep.subr.bf16.mxu0 %v5004_v0  ;;  %v5049_v63 = vld [vmem:[#allocation6 + $0x2c4] ss:$8 sps:$4 sm:$0xff]   ;;  %v5092_v0 = vld [vmem:[#allocation6 + $0x3d0] ss:$8 sps:$4 sm:$0xff]  }
 0x216   :  { %3895 = vmatprep.subr.bf16.mxu1 %v5007_v4  ;;  %v5052_v4 = vld [vmem:[#allocation6 + $0x2b4] ss:$8 sps:$4 sm:$0xff]  }
 0x218   :  { %3853 = vmatpush2.bf16.msra.mxu0 %v5002_v7  ;;  %v5100_v7 = vld [vmem:[#allocation6 + $0x3b4] ss:$8 sps:$4 sm:$0xff]  }
 0x219   :  { %3896 = vmatpush2.bf16.msra.mxu1 %v5005_v8  ;;  %3854 = vmatprep.subr.bf16.mxu0 %v5010_v37  ;;  %v5050_v8 = vld [vmem:[#allocation6 + $0x2b0] ss:$8 sps:$4 sm:$0xff]   ;;  %v5055_v37 = vld [vmem:[#allocation6 + $0x2a4] ss:$8 sps:$4 sm:$0xff]  }
 0x21a   :  { %3897 = vmatprep.subr.bf16.mxu1 %v5013_v9  ;;  %v5103_v9 = vld [vmem:[#allocation6 + $0x3a4] ss:$8 sps:$4 sm:$0xff]  }
 0x21c   :  { %3855 = vmatpush2.bf16.msra.mxu0 %v5008_v13 }
 0x21d   :  { %3898 = vmatpush2.bf16.msra.mxu1 %v5011_v57  ;;  %3910 = vmatprep.subr.bf16.mxu0 %v5016_v14  ;;  %v5058_v57 = vld [vmem:[#allocation6 + $0x294] ss:$8 sps:$4 sm:$0xff]   ;;  %v5101_v14 = vld [vmem:[#allocation6 + $0x3a0] ss:$8 sps:$4 sm:$0xff]  }
 0x21e   :  { %3953 = vmatprep.subr.bf16.mxu1 %v5064_v44  ;;  %v5056_v44 = vld [vmem:[#allocation6 + $0x290] ss:$8 sps:$4 sm:$0xff]  }
 0x21f   :  { %3857 = vmatmul.mubr.bf16.vlgmr.msra.gmra.mxu0 %v5486_v40  ;;  %v5028_v40 = vld [vmem:[#allocation6 + $0x234] ss:$8 sps:$4 sm:$0xff]   ;;  %v2796_v13 = vpop.f32.mrf.mxu0 }
 0x220   :  { %3900 = vmatmul.mubr.bf16.vlgmr.msra.gmra.mxu1 %v3038_v23  ;;  %3911 = vmatpush1.bf16.msra.mxu0 %v5014_v20  ;;  %v5061_v20 = vld [vmem:[#allocation6 + $0x284] ss:$8 sps:$4 sm:$0xff]  }
 0x221   :  { %3912 = vmatprep.subr.bf16.mxu0 %v5019_v21  ;;  %3954 = vmatpush1.bf16.msra.mxu1 %v5062_v60  ;;  %v2798_v18 = vpop.f32.mrf.mxu0  ;;  %v5104_v21 = vld [vmem:[#allocation6 + $0x390] ss:$8 sps:$4 sm:$0xff]   ;;  %v536_v60 = vsub.s32 5, %v5441_v17  ;;  %v5109_v23 = vld [vmem:[#allocation6 + $0x384] ss:$8 sps:$4 sm:$0xff]  }
 0x222   :  { %3955 = vmatprep.subr.bf16.mxu1 %v5067_v24  ;;  %v532_v24 = vsub.s32 4, %v5441_v17 }
 0x224   :  { %3913 = vmatpush1.bf16.msra.mxu0 %v5017_v29  ;;  %v2839_v29 = vpop.f32.mrf.mxu1 }
 0x225   :  { %3914 = vmatprep.subr.bf16.mxu0 %v5022_v25  ;;  %3956 = vmatpush1.bf16.msra.mxu1 %v5065_v26  ;;  %v5059_v25 = vld [vmem:[#allocation6 + $0x280] ss:$8 sps:$4 sm:$0xff]   ;;  %v2800_v26 = vpop.f32.mrf.mxu0 }
 0x226   :  { %3957 = vmatprep.subr.bf16.mxu1 %v5070_v5  ;;  %v5107_v5 = vld [vmem:[#allocation6 + $0x380] ss:$8 sps:$4 sm:$0xff]  }
 0x228   :  { %3915 = vmatpush1.bf16.msra.mxu0 %v5020_v28  ;;  %v537_v28 = vrot.slane %v5515_v49, %v536_v60 }
 0x229   :  { %3916 = vmatprep.subr.bf16.mxu0 %v5025_v30  ;;  %3958 = vmatpush1.bf16.msra.mxu1 %v5068_v56  ;;  %v533_v30 = vrot.slane %v5515_v49, %v532_v24  ;;  %v2841_v56 = vpop.f32.mrf.mxu1 }
 0x22a   :  { %3959 = vmatprep.subr.bf16.mxu1 %v5073_v51  ;;  %v2802_v51 = vpop.f32.mrf.mxu0 }
 0x22c   :  { %3917 = vmatpush1.bf16.msra.mxu0 %v5023_v31  ;;  %v2799_v31 = vadd.f32 %v2798_v18, %v537_v28 }
 0x22d   :  { %3918 = vmatprep.subr.bf16.mxu0 %v5028_v40  ;;  %3960 = vmatpush1.bf16.msra.mxu1 %v5071_v33  ;;  %v2801_v40 = vadd.f32 %v2800_v26, %v533_v30  ;;  %v2797_v33 = vadd.f32 %v2796_v13, %v533_v30  ;;  %v5110_v30 = vld [vmem:[%s5602_s5 + $0x78] sm:$0xff]  }
 0x22e   :  { %3961 = vmatprep.subr.bf16.mxu1 %v5076_v22  ;;  %v2843_v22 = vpop.f32.mrf.mxu1 }
 0x230   :  { %3919 = vmatpush1.bf16.msra.mxu0 %v5026_v34 }
 0x231   :  { %3920 = vmatprep.subr.bf16.mxu0 %v5031_v35  ;;  %3962 = vmatpush1.bf16.msra.mxu1 %v5074_v36  ;;  %v2803_v35 = vadd.f32 %v2802_v51, %v537_v28  ;;  %v5112_v51 = vld [vmem:[%s5602_s5 + $0x70] sm:$0xff]  }
 0x232   :  { %3963 = vmatprep.subr.bf16.mxu1 %v5079_v38  ;;  %v2842_v38 = vadd.f32 %v2841_v56, %v2799_v31  ;;  %v5111_v56 = vld [vmem:[%s5602_s5 + $0x38] sm:$0xff]   ;;  %v5113_v31 = vld [vmem:[%s5602_s5 + $0x30] sm:$0xff]  }
 0x234   :  { %3921 = vmatpush1.bf16.msra.mxu0 %v5029_v16  ;;  %v2844_v16 = vadd.f32 %v2843_v22, %v2801_v40  ;;  %v5114_v40 = vld [vmem:[%s5602_s5 + $0x68] sm:$0xff]   ;;  %v5116_v22 = vld [vmem:[%s5602_s5 + $0x60] sm:$0xff]  }
 0x235   :  { %3922 = vmatprep.subr.bf16.mxu0 %v5034_v39  ;;  %3964 = vmatpush1.bf16.msra.mxu1 %v5077_v52  ;;  %v2840_v39 = vadd.f32 %v2839_v29, %v2797_v33  ;;  %v2845_v52 = vpop.f32.mrf.mxu1  ;;  %v5115_v33 = vld [vmem:[%s5602_s5 + $0x28] sm:$0xff]  }
 0x236   :  { %3965 = vmatprep.subr.bf16.mxu1 %v5082_v32 }
 0x238   :  { %3923 = vmatpush1.bf16.msra.mxu0 %v5032_v2  ;;  %v2846_v2 = vadd.f32 %v2845_v52, %v2803_v35  ;;  %v5118_v35 = vld [vmem:[%s5602_s5 + $0x58] sm:$0xff]   ;;  %v5123_v52 = vld [vmem:[%s5602_s5 + $0x8] sm:$0xff]  }
 0x239   :  { %3924 = vmatprep.subr.bf16.mxu0 %v5037_v41  ;;  %3966 = vmatpush1.bf16.msra.mxu1 %v5080_v19 }
 0x23a   :  { %3967 = vmatprep.subr.bf16.mxu1 %v5085_v42 }
 0x23c   :  { %3925 = vmatpush1.bf16.msra.mxu0 %v5035_v43 }
 0x23d   :  { %3926 = vmatprep.subr.bf16.mxu0 %v5040_v45  ;;  %3968 = vmatpush1.bf16.msra.mxu1 %v5083_v46 }
 0x23e   :  { %3969 = vmatprep.subr.bf16.mxu1 %v5088_v47 }
 0x240   :  { %3927 = vmatpush2.bf16.msra.mxu0 %v5038_v59 }
 0x241   :  { %3928 = vmatprep.subr.bf16.mxu0 %v5043_v48  ;;  %3970 = vmatpush2.bf16.msra.mxu1 %v5086_v50 }
 0x242   :  { %3971 = vmatprep.subr.bf16.mxu1 %v5091_v53 }
 0x244   :  { %3929 = vmatpush2.bf16.msra.mxu0 %v5041_v54 }
 0x245   :  { %3930 = vmatprep.subr.bf16.mxu0 %v5046_v58  ;;  %3972 = vmatpush2.bf16.msra.mxu1 %v5089_v61  ;;  %v544_v61 = vsub.s32 7, %v5441_v17 }
 0x246   :  { %3973 = vmatprep.subr.bf16.mxu1 %v5094_v11  ;;  %v540_v11 = vsub.s32 6, %v5441_v17 }
 0x248   :  { %3931 = vmatpush2.bf16.msra.mxu0 %v5044_v62 }
 0x249   :  { %3932 = vmatprep.subr.bf16.mxu0 %v5049_v63  ;;  %3974 = vmatpush2.bf16.msra.mxu1 %v5092_v0  ;;  %v545_v63 = vrot.slane %v5515_v49, %v544_v61  ;;  %v541_v0 = vrot.slane %v5515_v49, %v540_v11 }
 0x24a   :  { %3975 = vmatprep.subr.bf16.mxu1 %v5097_v1 }
 0x24c   :  { %3933 = vmatpush2.bf16.msra.mxu0 %v5047_v3 }
 0x24d   :  { %3934 = vmatprep.subr.bf16.mxu0 %v5052_v4  ;;  %3976 = vmatpush2.bf16.msra.mxu1 %v5095_v6 }
 0x24e   :  { %3977 = vmatprep.subr.bf16.mxu1 %v5100_v7 }
 0x250   :  { %3935 = vmatpush2.bf16.msra.mxu0 %v5050_v8 }
 0x251   :  { %3936 = vmatprep.subr.bf16.mxu0 %v5055_v37  ;;  %3978 = vmatpush2.bf16.msra.mxu1 %v5098_v12 }
 0x252   :  { %3979 = vmatprep.subr.bf16.mxu1 %v5103_v9 }
 0x254   :  { %3937 = vmatpush2.bf16.msra.mxu0 %v5053_v10 }
 0x255   :  { %3938 = vmatprep.subr.bf16.mxu0 %v5058_v57  ;;  %3980 = vmatpush2.bf16.msra.mxu1 %v5101_v14 }
 0x256   :  { %3981 = vmatprep.subr.bf16.mxu1 %v5106_v15 }
 0x258   :  { %3939 = vmatpush2.bf16.msra.mxu0 %v5056_v44 }
 0x259   :  { %3940 = vmatprep.subr.bf16.mxu0 %v5061_v20  ;;  %3982 = vmatpush2.bf16.msra.mxu1 %v5104_v21 }
 0x25a   :  { %3983 = vmatprep.subr.bf16.mxu1 %v5109_v23 }
 0x25c   :  { %3941 = vmatpush2.bf16.msra.mxu0 %v5059_v25 }
 0x25d   :  { %3984 = vmatpush2.bf16.msra.mxu1 %v5107_v5  ;;  %4855 = vmatprep.subr.bf16.mxu0 %v5110_v30 }
 0x25f   :  { %v2882_v34 = vpop.f32.mrf.mxu0 }
 0x260   :  { %v2883_v42 = vadd.f32 %v2882_v34, %v2840_v39  ;;  %v2925_v54 = vpop.f32.mrf.mxu1  ;;  %v5117_v34 = vld [vmem:[%s5602_s5 + $0x20] sm:$0xff]   ;;  %v5122_v39 = vld [vmem:[%s5602_s5 + $0x48] sm:$0xff]  }
 0x261   :  { %v2884_v36 = vpop.f32.mrf.mxu0  ;;  %v2926_v7 = vadd.f32 %v2925_v54, %v541_v0 }
 0x262   :  { %v2885_v41 = vadd.f32 %v2884_v36, %v2842_v38  ;;  %v3024_v48 = vmax.f32 %v2883_v42, 0.0  ;;  %v2927_v58 = vpop.f32.mrf.mxu1  ;;  %v5119_v36 = vld [vmem:[%s5602_s5 + $0x18] sm:$0xff]   ;;  %v5120_v38 = vld [vmem:[%s5602_s5 + $0x50] sm:$0xff]  }
 0x263   :  { %v2886_v32 = vpop.f32.mrf.mxu0  ;;  %v2928_v4 = vadd.f32 %v2927_v58, %v545_v63 }
 0x264   :  { %v2887_v19 = vadd.f32 %v2886_v32, %v2844_v16  ;;  %v3025_v47 = vmax.f32 %v2885_v41, 0.0  ;;  %v2929_v62 = vpop.f32.mrf.mxu1  ;;  %v5121_v16 = vld [vmem:[%s5602_s5 + $0x10] sm:$0xff]   ;;  %v5124_v32 = vld [vmem:[%s5602_s5 + $0x40] sm:$0xff]   ;;  %v5307_v41 = vmov 0.0  }
 0x265   :  { %v2888_v43 = vpop.f32.mrf.mxu0  ;;  %v2930_v37 = vadd.f32 %v2929_v62, %v541_v0  ;;  %4882 = vmatprep.subr.bf16.mxu1 %v5307_v41 }
 0x266   :  { %v2889_v45 = vadd.f32 %v2888_v43, %v2846_v2  ;;  %v3032_v46 = vmax.f32 %v2887_v19, 0.0  ;;  %v2931_v1 = vpop.f32.mrf.mxu1  ;;  %v5125_v2 = vld [vmem:[%s5602_s5] sm:$0xff]  }
 0x267   :  { %v2932_v57 = vadd.f32 %v2931_v1, %v545_v63 }
 0x268   :  { %v3033_v59 = vmax.f32 %v2889_v45, 0.0  ;;  %v3040_v53 = vpack.c.bf16 %v3032_v46, %v3024_v48  ;;  %v3172_v45 = vld [vmem:[#allocation7] sm:$0x3] }
 0x26a   :  { %v3041_v50 = vpack.c.bf16 %v3033_v59, %v3025_v47  ;;  %v3177_v59 = vrot.slane %v3172_v45, %v516_v27 }
 0x26c   :  { %3942 = vmatprep.mubr.bf16.mxu0 %v3041_v50 }
 0x26d   :  { %3943 = vmatmul.mubr.bf16.vlgmr.msra.gmra.mxu0 %v3040_v53  ;;  %v3181_v53 = vrot.slane %v3172_v45, %v520_v55 }
 0x26e   :  { %4856 = vmatpush3.bf16.msra.mxu0 %v5111_v56 }
 0x26f   :  { %4857 = vmatprep.subr.bf16.mxu0 %v5112_v51 }
 0x272   :  { %4858 = vmatpush3.bf16.msra.mxu0 %v5113_v31  ;;  %v4830_v31 = vld [vmem:[#allocation9] ss:$0 sm:$0xff] }
 0x273   :  { %4859 = vmatprep.subr.bf16.mxu0 %v5114_v40 }
 0x276   :  { %4860 = vmatpush3.bf16.msra.mxu0 %v5115_v33 }
 0x277   :  { %4861 = vmatprep.subr.bf16.mxu0 %v5116_v22 }
 0x27a   :  { %4862 = vmatpush3.bf16.msra.mxu0 %v5117_v34 }
 0x27b   :  { %4863 = vmatprep.subr.bf16.mxu0 %v5118_v35 }
 0x27e   :  { %4864 = vmatpush3.bf16.msra.mxu0 %v5119_v36 }
 0x27f   :  { %4865 = vmatprep.subr.bf16.mxu0 %v5120_v38 }
 0x282   :  { %4866 = vmatpush3.bf16.msra.mxu0 %v5121_v16 }
 0x283   :  { %4867 = vmatprep.subr.bf16.mxu0 %v5122_v39  ;;  %v4847_v39 = vld [vmem:[#allocation12] ss:$0 sm:$0xff] }
 0x286   :  { %4868 = vmatpush3.bf16.msra.mxu0 %v5123_v52 }
 0x287   :  { %4869 = vmatprep.subr.bf16.mxu0 %v5124_v32 }
 0x28a   :  { %4870 = vmatpush3.bf16.msra.mxu0 %v5125_v2 }
 0x29f   :  { %v2968_v3 = vpop.f32.mrf.mxu0 }
 0x2a0   :  { %v3011_v6 = vpop.f32.mrf.mxu1  ;;  %v2969_v10 = vadd.f32 %v2968_v3, %v2926_v7 }
 0x2a1   :  { %v2970_v8 = vpop.f32.mrf.mxu0 }
 0x2a2   :  { %v2971_v12 = vadd.f32 %v2970_v8, %v2928_v4  ;;  %v3013_v9 = vpop.f32.mrf.mxu1  ;;  %v3012_v60 = vadd.f32 %v3011_v6, %v2969_v10 }
 0x2a3   :  { %v2972_v13 = vpop.f32.mrf.mxu0 }
 0x2a4   :  { %v2973_v14 = vadd.f32 %v2972_v13, %v2930_v37  ;;  %v3015_v15 = vpop.f32.mrf.mxu1  ;;  %v3014_v18 = vadd.f32 %v3013_v9, %v2971_v12  ;;  %v3026_v26 = vmax.f32 %v3012_v60, 0.0 }
 0x2a5   :  { %v2974_v44 = vpop.f32.mrf.mxu0 }
 0x2a6   :  { %v3016_v20 = vadd.f32 %v3015_v15, %v2973_v14  ;;  %v2975_v21 = vadd.f32 %v2974_v44, %v2932_v57  ;;  %v3017_v49 = vpop.f32.mrf.mxu1  ;;  %v3027_v29 = vmax.f32 %v3014_v18, 0.0 }
 0x2a8   :  { %v3018_v23 = vadd.f32 %v3017_v49, %v2975_v21  ;;  %v3034_v24 = vmax.f32 %v3016_v20, 0.0 }
 0x2aa   :  { %v3035_v25 = vmax.f32 %v3018_v23, 0.0  ;;  %v3042_v28 = vpack.c.bf16 %v3034_v24, %v3026_v26  ;;  %v5127_v26 = vld [vmem:[#allocation10 + $0x10] sm:$0xff]  }
 0x2ac   :  { %v3043_v5 = vpack.c.bf16 %v3035_v25, %v3027_v29  ;;  %v5126_v25 = vld [vmem:[#allocation10 + $0x18] sm:$0xff]  }
 0x2ae   :  { %3985 = vmatprep.mubr.bf16.mxu1 %v3043_v5  ;;  %v5128_v5 = vld [vmem:[#allocation10 + $0x8] sm:$0xff]  }
 0x2af   :  { %3986 = vmatmul.mubr.bf16.vlgmr.msra.gmra.mxu1 %v3042_v28  ;;  %v5129_v28 = vld [vmem:[#allocation10] sm:$0xff]  }
 0x2b0   :  { %4883 = vmatpush3.bf16.msra.mxu1 %v5126_v25  ;;  %4890 = vmatprep.mubr.msk.bf16.mxu1 %vm5308_vm0, %v5307_v41 }
 0x2b1   :  { %4884 = vmatprep.subr.bf16.mxu1 %v5307_v41 }
 0x2b4   :  { %4885 = vmatpush3.bf16.msra.mxu1 %v5127_v26 }
 0x2b5   :  { %4886 = vmatprep.subr.bf16.mxu1 %v5307_v41 }
 0x2b8   :  { %4887 = vmatpush3.bf16.msra.mxu1 %v5128_v5 }
 0x2b9   :  { %4888 = vmatprep.subr.bf16.mxu1 %v5307_v41 }
 0x2bc   :  { %4889 = vmatpush3.bf16.msra.mxu1 %v5129_v28 }
 0x2df   :  { %v3858_v19 = vpop.f32.mrf.mxu0 }
 0x2e0   :  { %v3901_v46 = vpop.f32.mrf.mxu1  ;;  %v3859_v54 = vadd.f32 %v3858_v19, %v3177_v59 }
 0x2e1   :  { %v3860_v42 = vpop.f32.mrf.mxu0 }
 0x2e2   :  { %v3903_v48 = vpop.f32.mrf.mxu1  ;;  %v3861_v11 = vadd.f32 %v3860_v42, %v3181_v53  ;;  %v3902_v62 = vadd.f32 %v3901_v46, %v3859_v54 }
 0x2e3   :  { %v3862_v43 = vpop.f32.mrf.mxu0 }
 0x2e4   :  { %v3905_v58 = vpop.f32.mrf.mxu1  ;;  %v3863_v63 = vadd.f32 %v3862_v43, %v3177_v59  ;;  %v3904_v3 = vadd.f32 %v3903_v48, %v3861_v11 }
 0x2e5   :  { %v3864_v47 = vpop.f32.mrf.mxu0 }
 0x2e6   :  { %v3907_v0 = vpop.f32.mrf.mxu1  ;;  %v3865_v4 = vadd.f32 %v3864_v47, %v3181_v53  ;;  %v3906_v8 = vadd.f32 %v3905_v58, %v3863_v63 }
 0x2e8   :  { %v3908_v10 = vadd.f32 %v3907_v0, %v3865_v4 }
 0x32d   :  { %v3944_v50 = vpop.f32.mrf.mxu0 }
 0x32e   :  { %v3945_v6 = vadd.f32 %v3944_v50, %v3902_v62 }
 0x32f   :  { %v3946_v61 = vpop.f32.mrf.mxu0 }
 0x330   :  { %v3947_v37 = vadd.f32 %v3946_v61, %v3904_v3 }
 0x331   :  { %v3948_v1 = vpop.f32.mrf.mxu0 }
 0x332   :  { %v3949_v17 = vadd.f32 %v3948_v1, %v3906_v8 }
 0x333   :  { %v3950_v12 = vpop.f32.mrf.mxu0 }
 0x334   :  { %v3951_v57 = vadd.f32 %v3950_v12, %v3908_v10 }
 0x36f   :  { %v3987_v7 = vpop.f32.mrf.mxu1 }
 0x370   :  { %v3988_v27 = vadd.f32 %v3987_v7, %v3945_v6 }
 0x371   :  { %v3989_v9 = vpop.f32.mrf.mxu1 }
 0x372   :  { %v3990_v55 = vadd.f32 %v3989_v9, %v3947_v37  ;;  %v3996_v14 = vmax.f32 %v3988_v27, 0.0 }
 0x373   :  { %v3991_v13 = vpop.f32.mrf.mxu1 }
 0x374   :  { %v3997_v15 = vmax.f32 %v3990_v55, 0.0  ;;  %v3992_v44 = vadd.f32 %v3991_v13, %v3949_v17 }
 0x375   :  { %v3993_v18 = vpop.f32.mrf.mxu1 }
 0x376   :  { %v4853_v20 = vpack.c.bf16 %v3997_v15, %v3996_v14  ;;  %v3994_v21 = vadd.f32 %v3993_v18, %v3951_v57  ;;  %v3998_v60 = vmax.f32 %v3992_v44, 0.0 }
 0x378   :  { %4012 = vst [vmem:[%s5607_s10] sm:$0xff] %v4853_v20  ;;  %v3999_v49 = vmax.f32 %v3994_v21, 0.0  ;;  %v4000_v29 = vpack.c.bf16 %v3998_v60, %v3996_v14 }
 0x37a   :  { %v4001_v23 = vpack.c.bf16 %v3999_v49, %v3997_v15  ;;  %v4854_v24 = vpack.c.bf16 %v3999_v49, %v3998_v60 }
 0x37c   :  { %4013 = vst [vmem:[%s5607_s10 + $0x8] sm:$0xff] %v4854_v24  ;;  %4181 = vmatprep.mubr.bf16.mxu0 %v4001_v23 }
 0x37d   :  { %4182 = vmatmul.mubr.bf16.vlgmr.msra.gmra.mxu0 %v4000_v29 }
 0x43d   :  { %v4871_v30 = vpop.f32.mrf.mxu0 }
 0x43f   :  { %v4872_v56 = vpop.f32.mrf.mxu0 }
 0x440   :  { %v4873_v51 = vadd.f32 %v4872_v56, %v4871_v30 }
 0x441   :  { %v4874_v40 = vpop.f32.mrf.mxu0 }
 0x442   :  { %v4184_v22 = vadd.f32 %v4873_v51, %v4830_v31 }
 0x443   :  { %v4875_v33 = vpop.f32.mrf.mxu0 }
 0x444   :  { %v4876_v34 = vadd.f32 %v4875_v33, %v4874_v40  ;;  %v4190_v36 = vmax.f32 %v4184_v22, 0.0 }
 0x446   :  { %v4187_v35 = vadd.f32 %v4876_v34, %v4830_v31 }
 0x448   :  { %v4191_v38 = vmax.f32 %v4187_v35, 0.0 }
 0x44a   :  { %v4192_v16 = vpack.c.bf16 %v4191_v38, %v4190_v36 }
 0x44c   :  { %4891 = vmatmul.mubr.msk.bf16.vlgmr.msra.gmra.mxu1 %vm4232_vm1, %v4192_v16 }
 0x50c   :  { %v4270_v52 = vpop.f32.mrf.mxu1 }
 0x50d   :  { %v4271_v32 = vadd.f32 %v4847_v39, %v4270_v52 }
 0x50e   :  { %v4892_v2 = vpop.f32.mrf.mxu1 }
 0x50f   :  { %4277 = vmax.xlane.f32.xlu0 %v4271_v32 }
 0x510   :  { %v4273_v41 = vpop.f32.mrf.mxu1 }
 0x511   :  { %v4274_v19 = vadd.f32 %v4847_v39, %v4273_v41 }
 0x512   :  { %v4893_v42 = vpop.f32.mrf.mxu1 }
 0x513   :  { %4279 = vmax.xlane.f32.xlu0 %v4274_v19 }
 0x598   :  { %v4278_v43 = vpop.xlane.xlu0 %4277 }
 0x599   :  { %v4281_v45 = vsub.f32 %v4271_v32, %v4278_v43 }
 0x59b   :  { %v4283_v46 = vmul.f32 1.442695, %v4281_v45 }
 0x59c   :  { %v4280_v47 = vpop.xlane.xlu0 %4279 }
 0x59d   :  { %5130 = vpow2.f32 %v4283_v46  ;;  %v4282_v59 = vsub.f32 %v4274_v19, %v4280_v47 }
 0x59f   :  { %v4285_v48 = vmul.f32 1.442695, %v4282_v59 }
 0x5a1   :  { %5132 = vpow2.f32 %v4285_v48 }
 0x5aa   :  { %v5131_v50 = vpop.eup %5130 }
 0x5ab   :  { %4287 = vadd.xlane.f32.xlu1 %v5131_v50 }
 0x5ae   :  { %v5133_v53 = vpop.eup %5132 }
 0x5af   :  { %4289 = vadd.xlane.f32.xlu1 %v5133_v53 }
 0x634   :  { %v4288_v54 = vpop.xlane.xlu1 %4287 }
 0x635   :  { %5134 = vrcp.f32 %v4288_v54 }
 0x638   :  { %v4290_v58 = vpop.xlane.xlu1 %4289 }
 0x639   :  { %5136 = vrcp.f32 %v4290_v58 }
 0x642   :  { %v5135_v61 = vpop.eup %5134 }
 0x643   :  { %v4292_v11 = vmul.f32 %v5135_v61, %v5131_v50 }
 0x645   :  { %4296 = vst.msk [vmem:[%s5606_s9] sm:$0xff] %vm4295_vm2, %v4292_v11 }
 0x646   :  { %v5137_v62 = vpop.eup %5136 }
 0x647   :  { %v4294_v63 = vmul.f32 %v5137_v62, %v5133_v53 }
 0x649   :  { %4297 = vst.msk [vmem:[%s5606_s9 + $0x8] sm:$0xff] %vm4295_vm2, %v4294_v63 }
 0x64a   :  { %4306 = vsyncpa [#allocation3], 1 }
 0x64b   :  { %4307 = vsyncpa [#allocation5], 1 }
 0x64c   :  { %4308 = vsyncpa [#allocation8], 1 }
 0x64d   :  { %4309 = vsyncpa [#allocation11], 1 }

</bundles_post_ra>
